<compile_context>
chip_gen: v7x
topology: tpu7x:2x2x1
jax: 0.10.0
libtpu: 0.0.40
codegen_flags: <defaults>
</compile_context>

<pallas_src>
import jax
import jax.numpy as jnp
from jax.experimental import pallas as pl
from jax.experimental.pallas import tpu as pltpu


def _round_up(x, m):
    return ((x + m - 1) // m) * m


def _pad_axis(x, axis, new_size):
    if x.shape[axis] == new_size:
        return x
    pads = [(0, 0)] * x.ndim
    pads[axis] = (0, new_size - x.shape[axis])
    return jnp.pad(x, pads)


# ----------------------------------------------------------------------------
# Kernel 1: Elman RNN recurrence.  One grid step per sequence (passage /
# question); the time loop is fully unrolled inside the kernel so only the
# serial h @ Wh + tanh sits on the critical path.
# ----------------------------------------------------------------------------
def rnn_scan_kernel(xp_ref, wh_ref, out_ref):
    """xp_ref : (1, B, T, H)  hoisted x@Wx + b (time-parallel, precomputed)
       wh_ref : (1, H, H)     recurrent weight
       out_ref: (1, B, T, H)  all hidden states (batch-major)"""
    T = xp_ref.shape[2]
    wh = wh_ref[0]                      # (H, H), loaded once, reused every step

    # h0 = 0  ->  h1 = tanh(x1 @ Wx + b)
    h = jnp.tanh(xp_ref[0, :, 0, :])
    out_ref[0, :, 0, :] = h

    # Fully-unrolled static time loop: every VMEM access uses static indices;
    # only the inherently sequential matmul + tanh remains per step.
    for t in range(1, T):
        h = jnp.tanh(xp_ref[0, :, t, :] +
                     jnp.dot(h, wh, preferred_element_type=jnp.float32))
        out_ref[0, :, t, :] = h


def rnn_encode_pair(xproj, wh):
    """xproj: (2, B, T, H), wh: (2, H, H) -> (2, B, T, H) hidden states."""
    S, B, T, H = xproj.shape
    return pl.pallas_call(
        rnn_scan_kernel,
        out_shape=jax.ShapeDtypeStruct((S, B, T, H), jnp.float32),
        grid=(S,),
        in_specs=[
            pl.BlockSpec((1, B, T, H), lambda s: (s, 0, 0, 0)),
            pl.BlockSpec((1, H, H), lambda s: (s, 0, 0)),
        ],
        out_specs=pl.BlockSpec((1, B, T, H), lambda s: (s, 0, 0, 0)),
        compiler_params=pltpu.CompilerParams(
            # passage / question encodes are independent -> v7x runs them on
            # the two TensorCores; v5e/v6e just loop over the two blocks.
            dimension_semantics=("parallel",)),
    )(xproj, wh)


# ----------------------------------------------------------------------------
# Kernel 2: bilinear start/end logits + masking + masked log-softmax.
# ----------------------------------------------------------------------------
def logits_kernel(p_ref, q_ref, wse_ref, mask_ref,
                  start_ref, end_ref, lstart_ref, lend_ref):
    H = q_ref.shape[1]
    p = p_ref[...]        # (B, T, H)
    q = q_ref[...]        # (B, H)
    mask = mask_ref[...]  # (B, T) float32, 1.0 = valid token

    # Single MXU push for both bilinear projections (w_start | w_end stacked).
    qse = jnp.dot(q, wse_ref[...], preferred_element_type=jnp.float32)  # (B, 2H)
    qs = qse[:, :H]                       # lane-aligned slices (H is a 128 multiple)
    qe = qse[:, H:]

    raw_start = jnp.sum(p * qs[:, None, :], axis=-1)  # (B, T)
    raw_end = jnp.sum(p * qe[:, None, :], axis=-1)    # (B, T)
    # NOTE: at scaled RC shapes (T~500, H~256) this kernel should tile over T
    # (BlockSpec((B, tT, H)) + online log-sum-exp) with an explicit
    # vmem_limit_bytes, and express the scores as a batched dot_general.

    neg = jnp.float32(-1e7)
    start_logits = jnp.where(mask > 0, raw_start, neg)
    end_logits = jnp.where(mask > 0, raw_end, neg)

    def log_softmax(z):
        m = jnp.max(z, axis=-1, keepdims=True)
        lse = jnp.log(jnp.sum(jnp.exp(z - m), axis=-1, keepdims=True)) + m
        return z - lse

    start_ref[...] = start_logits
    end_ref[...] = end_logits
    lstart_ref[...] = log_softmax(start_logits)
    lend_ref[...] = log_softmax(end_logits)


def span_logits(p_enc, q_rep, w_se, mask):
    """p_enc: (B, T, H), q_rep: (B, H), w_se: (H, 2H), mask: (B, T) -> 4x(B, T)."""
    B, T, H = p_enc.shape
    out_sd = jax.ShapeDtypeStruct((B, T), jnp.float32)
    return pl.pallas_call(
        logits_kernel,
        out_shape=(out_sd, out_sd, out_sd, out_sd),
        grid=(1,),
        in_specs=[
            pl.BlockSpec((B, T, H), lambda i: (0, 0, 0)),
            pl.BlockSpec((B, H), lambda i: (0, 0)),
            pl.BlockSpec((H, 2 * H), lambda i: (0, 0)),
            pl.BlockSpec((B, T), lambda i: (0, 0)),
        ],
        out_specs=(
            pl.BlockSpec((B, T), lambda i: (0, 0)),
            pl.BlockSpec((B, T), lambda i: (0, 0)),
            pl.BlockSpec((B, T), lambda i: (0, 0)),
            pl.BlockSpec((B, T), lambda i: (0, 0)),
        ),
        compiler_params=pltpu.CompilerParams(
            dimension_semantics=("arbitrary",)),
    )(p_enc, q_rep, w_se, mask)


# ----------------------------------------------------------------------------
# Full forward pass (mirrors the RNN module's documented forward contract).
# ----------------------------------------------------------------------------
def rnn_rc_forward(params, passage, question):
    emb = params["embedding"]                 # (V, E), row 0 = PAD (zeros)
    H = params["p_wh"].shape[0]
    Hp = _round_up(H, 128)                    # lane-pad hidden dim (zero columns)

    # Embedding lookup (glue, plain JAX gather) — batch-major throughout.
    p_emb = emb[passage]                      # (B, Tp, E)
    q_emb = emb[question]                     # (B, Tq, E)
    Tp = p_emb.shape[1]
    Tq = q_emb.shape[1]
    Tm = max(Tp, Tq)

    def hoisted_xproj(x_emb, wx, b):
        # Time-parallel input projection hoisted out of the recurrence:
        # one batched matmul (XLA), bias folded in; zero-pad H to Hp and the
        # time axis to Tm so both sequences share one Pallas block shape.
        xp = jnp.einsum('bte,eh->bth', x_emb, _pad_axis(wx, 1, Hp)) \
             + _pad_axis(b, 1, Hp)
        return _pad_axis(xp, 1, Tm)

    xproj = jnp.stack(
        [hoisted_xproj(p_emb, params["p_wx"], params["p_b"]),
         hoisted_xproj(q_emb, params["q_wx"], params["q_b"])], axis=0)   # (2,B,Tm,Hp)
    wh = jnp.stack(
        [_pad_axis(_pad_axis(params["p_wh"], 0, Hp), 1, Hp),
         _pad_axis(_pad_axis(params["q_wh"], 0, Hp), 1, Hp)], axis=0)    # (2,Hp,Hp)

    enc = rnn_encode_pair(xproj, wh)          # (2, B, Tm, Hp)
    p_enc = enc[0, :, :Tp, :]                 # (B, Tp, Hp)
    q_rep = enc[1, :, Tq - 1, :]              # (B, Hp) hidden at last question index
    # TODO(synk): as in the original stub version, PAD positions are not skipped
    # in the recurrence (no pack_padded_sequence semantics) and dropout is
    # omitted (inference-mode forward); the assignment never fixes these.

    w_se = jnp.concatenate(
        [_pad_axis(_pad_axis(params["w_start"], 0, Hp), 1, Hp),
         _pad_axis(_pad_axis(params["w_end"], 0, Hp), 1, Hp)], axis=1)   # (Hp, 2Hp)

    mask = (passage != 0).astype(jnp.float32)  # (B, Tp)

    start_logits, end_logits, sm_start, sm_end = span_logits(
        p_enc, q_rep, w_se, mask)

    return {
        "start_logits": start_logits,
        "end_logits": end_logits,
        "softmax_start_logits": sm_start,
        "softmax_end_logits": sm_end,
    }


def init_params(key, num_words, embedding_dim, hidden_size):
    ks = jax.random.split(key, 8)
    scale = 0.1
    emb = scale * jax.random.normal(ks[0], (num_words, embedding_dim),
                                    jnp.float32)
    emb = emb.at[0].set(0.0)  # PAD row
    return {
        "embedding": emb,
        "p_wx": scale * jax.random.normal(ks[1], (embedding_dim, hidden_size),
                                          jnp.float32),
        "p_wh": scale * jax.random.normal(ks[2], (hidden_size, hidden_size),
                                          jnp.float32),
        "p_b": jnp.zeros((1, hidden_size), jnp.float32),
        "q_wx": scale * jax.random.normal(ks[3], (embedding_dim, hidden_size),
                                          jnp.float32),
        "q_wh": scale * jax.random.normal(ks[4], (hidden_size, hidden_size),
                                          jnp.float32),
        "q_b": jnp.zeros((1, hidden_size), jnp.float32),
        "w_start": scale * jax.random.normal(ks[5], (hidden_size, hidden_size),
                                             jnp.float32),
        "w_end": scale * jax.random.normal(ks[6], (hidden_size, hidden_size),
                                           jnp.float32),
    }


if __name__ == "__main__":
    key = jax.random.PRNGKey(0)
    k_param, k_p, k_q = jax.random.split(key, 3)

    batch_size = 2
    passage_len = 16
    question_len = 8
    num_words = 100
    embedding_dim = 32
    hidden_size = 32

    params = init_params(k_param, num_words, embedding_dim, hidden_size)

    passage = jax.random.randint(k_p, (batch_size, passage_len), 1, num_words,
                                 dtype=jnp.int32)
    # Make the passages ragged (trailing PAD=0 tokens) so masking is exercised.
    passage = passage.at[0, 12:].set(0)
    passage = passage.at[1, 14:].set(0)
    question = jax.random.randint(k_q, (batch_size, question_len), 1,
                                  num_words, dtype=jnp.int32)

    forward = jax.jit(rnn_rc_forward)
    out = forward(params, passage, question)
    jax.block_until_ready(out)

    assert out["start_logits"].shape == (batch_size, passage_len)
    assert out["end_logits"].shape == (batch_size, passage_len)
    assert out["softmax_start_logits"].shape == (batch_size, passage_len)
    assert out["softmax_end_logits"].shape == (batch_size, passage_len)

    print("KERNEL_OK")
</pallas_src>

<mosaic_0001>
module attributes {stable_mosaic.version = 11 : i64} {
  func.func @rnn_scan_kernel(%arg0: i32, %arg1: memref<1x2x16x128xf32, #tpu.memory_space<vmem>>, %arg2: memref<1x128x128xf32, #tpu.memory_space<vmem>>, %arg3: memref<1x2x16x128xf32, #tpu.memory_space<vmem>>) attributes {dimension_semantics = [#tpu.dimension_semantics<parallel>], iteration_bounds = array<i64: 2>, scalar_prefetch = 0 : i64, scratch_operands = 0 : i64, tpu.core_type = #tpu.core_type<tc>, window_params = [{transform_indices = @transform_0, window_bounds = array<i64: 1, 2, 16, 128>}, {transform_indices = @transform_1, window_bounds = array<i64: 1, 128, 128>}, {transform_indices = @transform_2, window_bounds = array<i64: 1, 2, 16, 128>}]} {
    %c0 = arith.constant 0 : index
    %c0_0 = arith.constant 0 : index
    %c0_1 = arith.constant 0 : index
    %0 = vector.load %arg2[%c0, %c0_0, %c0_1] : memref<1x128x128xf32, #tpu.memory_space<vmem>>, vector<1x128x128xf32>
    %1 = vector.shape_cast %0 : vector<1x128x128xf32> to vector<128x128xf32>
    %c0_2 = arith.constant 0 : index
    %c0_3 = arith.constant 0 : index
    %c0_4 = arith.constant 0 : index
    %c0_5 = arith.constant 0 : index
    %2 = vector.load %arg1[%c0_2, %c0_3, %c0_4, %c0_5] : memref<1x2x16x128xf32, #tpu.memory_space<vmem>>, vector<1x2x1x128xf32>
    %3 = vector.shape_cast %2 : vector<1x2x1x128xf32> to vector<2x128xf32>
    %4 = math.tanh %3 : vector<2x128xf32>
    %c0_6 = arith.constant 0 : index
    %c0_7 = arith.constant 0 : index
    %c0_8 = arith.constant 0 : index
    %c0_9 = arith.constant 0 : index
    %5 = vector.load %arg3[%c0_6, %c0_7, %c0_8, %c0_9] : memref<1x2x16x128xf32, #tpu.memory_space<vmem>>, vector<1x2x1x128xf32>
    %6 = vector.shape_cast %5 : vector<1x2x1x128xf32> to vector<2x128xf32>
    %7 = vector.shape_cast %4 : vector<2x128xf32> to vector<1x2x1x128xf32>
    tpu.vector_store %arg3[%c0_6, %c0_7, %c0_8, %c0_9], %7 {strides = array<i32>} : memref<1x2x16x128xf32, #tpu.memory_space<vmem>>, vector<1x2x1x128xf32>,
    %c0_10 = arith.constant 0 : index
    %c0_11 = arith.constant 0 : index
    %c1 = arith.constant 1 : index
    %c0_12 = arith.constant 0 : index
    %8 = vector.load %arg1[%c0_10, %c0_11, %c1, %c0_12] : memref<1x2x16x128xf32, #tpu.memory_space<vmem>>, vector<1x2x1x128xf32>
    %9 = vector.shape_cast %8 : vector<1x2x1x128xf32> to vector<2x128xf32>
    %cst = arith.constant dense<0.000000e+00> : vector<2x128xf32>
    %10 = tpu.matmul %4, %1, %cst {dimension_numbers = #tpu.dot_dimension_numbers<[1], [0], [0], [1], [0, 0, 1, 1], [], []>} : vector<2x128xf32>, vector<128x128xf32>, vector<2x128xf32> -> vector<2x128xf32>
    %11 = arith.addf %9, %10 : vector<2x128xf32>
    %12 = math.tanh %11 : vector<2x128xf32>
    %c0_13 = arith.constant 0 : index
    %c0_14 = arith.constant 0 : index
    %c1_15 = arith.constant 1 : index
    %c0_16 = arith.constant 0 : index
    %13 = vector.load %arg3[%c0_13, %c0_14, %c1_15, %c0_16] : memref<1x2x16x128xf32, #tpu.memory_space<vmem>>, vector<1x2x1x128xf32>
    %14 = vector.shape_cast %13 : vector<1x2x1x128xf32> to vector<2x128xf32>
    %15 = vector.shape_cast %12 : vector<2x128xf32> to vector<1x2x1x128xf32>
    tpu.vector_store %arg3[%c0_13, %c0_14, %c1_15, %c0_16], %15 {strides = array<i32>} : memref<1x2x16x128xf32, #tpu.memory_space<vmem>>, vector<1x2x1x128xf32>,
    %c0_17 = arith.constant 0 : index
    %c0_18 = arith.constant 0 : index
    %c2 = arith.constant 2 : index
    %c0_19 = arith.constant 0 : index
    %16 = vector.load %arg1[%c0_17, %c0_18, %c2, %c0_19] : memref<1x2x16x128xf32, #tpu.memory_space<vmem>>, vector<1x2x1x128xf32>
    %17 = vector.shape_cast %16 : vector<1x2x1x128xf32> to vector<2x128xf32>
    %cst_20 = arith.constant dense<0.000000e+00> : vector<2x128xf32>
    %18 = tpu.matmul %12, %1, %cst_20 {dimension_numbers = #tpu.dot_dimension_numbers<[1], [0], [0], [1], [0, 0, 1, 1], [], []>} : vector<2x128xf32>, vector<128x128xf32>, vector<2x128xf32> -> vector<2x128xf32>
    %19 = arith.addf %17, %18 : vector<2x128xf32>
    %20 = math.tanh %19 : vector<2x128xf32>
    %c0_21 = arith.constant 0 : index
    %c0_22 = arith.constant 0 : index
    %c2_23 = arith.constant 2 : index
    %c0_24 = arith.constant 0 : index
    %21 = vector.load %arg3[%c0_21, %c0_22, %c2_23, %c0_24] : memref<1x2x16x128xf32, #tpu.memory_space<vmem>>, vector<1x2x1x128xf32>
    %22 = vector.shape_cast %21 : vector<1x2x1x128xf32> to vector<2x128xf32>
    %23 = vector.shape_cast %20 : vector<2x128xf32> to vector<1x2x1x128xf32>
    tpu.vector_store %arg3[%c0_21, %c0_22, %c2_23, %c0_24], %23 {strides = array<i32>} : memref<1x2x16x128xf32, #tpu.memory_space<vmem>>, vector<1x2x1x128xf32>,
    %c0_25 = arith.constant 0 : index
    %c0_26 = arith.constant 0 : index
    %c3 = arith.constant 3 : index
    %c0_27 = arith.constant 0 : index
    %24 = vector.load %arg1[%c0_25, %c0_26, %c3, %c0_27] : memref<1x2x16x128xf32, #tpu.memory_space<vmem>>, vector<1x2x1x128xf32>
    %25 = vector.shape_cast %24 : vector<1x2x1x128xf32> to vector<2x128xf32>
    %cst_28 = arith.constant dense<0.000000e+00> : vector<2x128xf32>
    %26 = tpu.matmul %20, %1, %cst_28 {dimension_numbers = #tpu.dot_dimension_numbers<[1], [0], [0], [1], [0, 0, 1, 1], [], []>} : vector<2x128xf32>, vector<128x128xf32>, vector<2x128xf32> -> vector<2x128xf32>
    %27 = arith.addf %25, %26 : vector<2x128xf32>
    %28 = math.tanh %27 : vector<2x128xf32>
    %c0_29 = arith.constant 0 : index
    %c0_30 = arith.constant 0 : index
    %c3_31 = arith.constant 3 : index
    %c0_32 = arith.constant 0 : index
    %29 = vector.load %arg3[%c0_29, %c0_30, %c3_31, %c0_32] : memref<1x2x16x128xf32, #tpu.memory_space<vmem>>, vector<1x2x1x128xf32>
    %30 = vector.shape_cast %29 : vector<1x2x1x128xf32> to vector<2x128xf32>
    %31 = vector.shape_cast %28 : vector<2x128xf32> to vector<1x2x1x128xf32>
    tpu.vector_store %arg3[%c0_29, %c0_30, %c3_31, %c0_32], %31 {strides = array<i32>} : memref<1x2x16x128xf32, #tpu.memory_space<vmem>>, vector<1x2x1x128xf32>,
    %c0_33 = arith.constant 0 : index
    %c0_34 = arith.constant 0 : index
    %c4 = arith.constant 4 : index
    %c0_35 = arith.constant 0 : index
    %32 = vector.load %arg1[%c0_33, %c0_34, %c4, %c0_35] : memref<1x2x16x128xf32, #tpu.memory_space<vmem>>, vector<1x2x1x128xf32>
    %33 = vector.shape_cast %32 : vector<1x2x1x128xf32> to vector<2x128xf32>
    %cst_36 = arith.constant dense<0.000000e+00> : vector<2x128xf32>
    %34 = tpu.matmul %28, %1, %cst_36 {dimension_numbers = #tpu.dot_dimension_numbers<[1], [0], [0], [1], [0, 0, 1, 1], [], []>} : vector<2x128xf32>, vector<128x128xf32>, vector<2x128xf32> -> vector<2x128xf32>
    %35 = arith.addf %33, %34 : vector<2x128xf32>
    %36 = math.tanh %35 : vector<2x128xf32>
    %c0_37 = arith.constant 0 : index
    %c0_38 = arith.constant 0 : index
    %c4_39 = arith.constant 4 : index
    %c0_40 = arith.constant 0 : index
    %37 = vector.load %arg3[%c0_37, %c0_38, %c4_39, %c0_40] : memref<1x2x16x128xf32, #tpu.memory_space<vmem>>, vector<1x2x1x128xf32>
    %38 = vector.shape_cast %37 : vector<1x2x1x128xf32> to vector<2x128xf32>
    %39 = vector.shape_cast %36 : vector<2x128xf32> to vector<1x2x1x128xf32>
    tpu.vector_store %arg3[%c0_37, %c0_38, %c4_39, %c0_40], %39 {strides = array<i32>} : memref<1x2x16x128xf32, #tpu.memory_space<vmem>>, vector<1x2x1x128xf32>,
    %c0_41 = arith.constant 0 : index
    %c0_42 = arith.constant 0 : index
    %c5 = arith.constant 5 : index
    %c0_43 = arith.constant 0 : index
    %40 = vector.load %arg1[%c0_41, %c0_42, %c5, %c0_43] : memref<1x2x16x128xf32, #tpu.memory_space<vmem>>, vector<1x2x1x128xf32>
    %41 = vector.shape_cast %40 : vector<1x2x1x128xf32> to vector<2x128xf32>
    %cst_44 = arith.constant dense<0.000000e+00> : vector<2x128xf32>
    %42 = tpu.matmul %36, %1, %cst_44 {dimension_numbers = #tpu.dot_dimension_numbers<[1], [0], [0], [1], [0, 0, 1, 1], [], []>} : vector<2x128xf32>, vector<128x128xf32>, vector<2x128xf32> -> vector<2x128xf32>
    %43 = arith.addf %41, %42 : vector<2x128xf32>
    %44 = math.tanh %43 : vector<2x128xf32>
    %c0_45 = arith.constant 0 : index
    %c0_46 = arith.constant 0 : index
    %c5_47 = arith.constant 5 : index
    %c0_48 = arith.constant 0 : index
    %45 = vector.load %arg3[%c0_45, %c0_46, %c5_47, %c0_48] : memref<1x2x16x128xf32, #tpu.memory_space<vmem>>, vector<1x2x1x128xf32>
    %46 = vector.shape_cast %45 : vector<1x2x1x128xf32> to vector<2x128xf32>
    %47 = vector.shape_cast %44 : vector<2x128xf32> to vector<1x2x1x128xf32>
    tpu.vector_store %arg3[%c0_45, %c0_46, %c5_47, %c0_48], %47 {strides = array<i32>} : memref<1x2x16x128xf32, #tpu.memory_space<vmem>>, vector<1x2x1x128xf32>,
    %c0_49 = arith.constant 0 : index
    %c0_50 = arith.constant 0 : index
    %c6 = arith.constant 6 : index
    %c0_51 = arith.constant 0 : index
    %48 = vector.load %arg1[%c0_49, %c0_50, %c6, %c0_51] : memref<1x2x16x128xf32, #tpu.memory_space<vmem>>, vector<1x2x1x128xf32>
    %49 = vector.shape_cast %48 : vector<1x2x1x128xf32> to vector<2x128xf32>
    %cst_52 = arith.constant dense<0.000000e+00> : vector<2x128xf32>
    %50 = tpu.matmul %44, %1, %cst_52 {dimension_numbers = #tpu.dot_dimension_numbers<[1], [0], [0], [1], [0, 0, 1, 1], [], []>} : vector<2x128xf32>, vector<128x128xf32>, vector<2x128xf32> -> vector<2x128xf32>
    %51 = arith.addf %49, %50 : vector<2x128xf32>
    %52 = math.tanh %51 : vector<2x128xf32>
    %c0_53 = arith.constant 0 : index
    %c0_54 = arith.constant 0 : index
    %c6_55 = arith.constant 6 : index
    %c0_56 = arith.constant 0 : index
    %53 = vector.load %arg3[%c0_53, %c0_54, %c6_55, %c0_56] : memref<1x2x16x128xf32, #tpu.memory_space<vmem>>, vector<1x2x1x128xf32>
    %54 = vector.shape_cast %53 : vector<1x2x1x128xf32> to vector<2x128xf32>
    %55 = vector.shape_cast %52 : vector<2x128xf32> to vector<1x2x1x128xf32>
    tpu.vector_store %arg3[%c0_53, %c0_54, %c6_55, %c0_56], %55 {strides = array<i32>} : memref<1x2x16x128xf32, #tpu.memory_space<vmem>>, vector<1x2x1x128xf32>,
    %c0_57 = arith.constant 0 : index
    %c0_58 = arith.constant 0 : index
    %c7 = arith.constant 7 : index
    %c0_59 = arith.constant 0 : index
    %56 = vector.load %arg1[%c0_57, %c0_58, %c7, %c0_59] : memref<1x2x16x128xf32, #tpu.memory_space<vmem>>, vector<1x2x1x128xf32>
    %57 = vector.shape_cast %56 : vector<1x2x1x128xf32> to vector<2x128xf32>
    %cst_60 = arith.constant dense<0.000000e+00> : vector<2x128xf32>
    %58 = tpu.matmul %52, %1, %cst_60 {dimension_numbers = #tpu.dot_dimension_numbers<[1], [0], [0], [1], [0, 0, 1, 1], [], []>} : vector<2x128xf32>, vector<128x128xf32>, vector<2x128xf32> -> vector<2x128xf32>
    %59 = arith.addf %57, %58 : vector<2x128xf32>
    %60 = math.tanh %59 : vector<2x128xf32>
    %c0_61 = arith.constant 0 : index
    %c0_62 = arith.constant 0 : index
    %c7_63 = arith.constant 7 : index
    %c0_64 = arith.constant 0 : index
    %61 = vector.load %arg3[%c0_61, %c0_62, %c7_63, %c0_64] : memref<1x2x16x128xf32, #tpu.memory_space<vmem>>, vector<1x2x1x128xf32>
    %62 = vector.shape_cast %61 : vector<1x2x1x128xf32> to vector<2x128xf32>
    %63 = vector.shape_cast %60 : vector<2x128xf32> to vector<1x2x1x128xf32>
    tpu.vector_store %arg3[%c0_61, %c0_62, %c7_63, %c0_64], %63 {strides = array<i32>} : memref<1x2x16x128xf32, #tpu.memory_space<vmem>>, vector<1x2x1x128xf32>,
    %c0_65 = arith.constant 0 : index
    %c0_66 = arith.constant 0 : index
    %c8 = arith.constant 8 : index
    %c0_67 = arith.constant 0 : index
    %64 = vector.load %arg1[%c0_65, %c0_66, %c8, %c0_67] : memref<1x2x16x128xf32, #tpu.memory_space<vmem>>, vector<1x2x1x128xf32>
    %65 = vector.shape_cast %64 : vector<1x2x1x128xf32> to vector<2x128xf32>
    %cst_68 = arith.constant dense<0.000000e+00> : vector<2x128xf32>
    %66 = tpu.matmul %60, %1, %cst_68 {dimension_numbers = #tpu.dot_dimension_numbers<[1], [0], [0], [1], [0, 0, 1, 1], [], []>} : vector<2x128xf32>, vector<128x128xf32>, vector<2x128xf32> -> vector<2x128xf32>
    %67 = arith.addf %65, %66 : vector<2x128xf32>
    %68 = math.tanh %67 : vector<2x128xf32>
    %c0_69 = arith.constant 0 : index
    %c0_70 = arith.constant 0 : index
    %c8_71 = arith.constant 8 : index
    %c0_72 = arith.constant 0 : index
    %69 = vector.load %arg3[%c0_69, %c0_70, %c8_71, %c0_72] : memref<1x2x16x128xf32, #tpu.memory_space<vmem>>, vector<1x2x1x128xf32>
    %70 = vector.shape_cast %69 : vector<1x2x1x128xf32> to vector<2x128xf32>
    %71 = vector.shape_cast %68 : vector<2x128xf32> to vector<1x2x1x128xf32>
    tpu.vector_store %arg3[%c0_69, %c0_70, %c8_71, %c0_72], %71 {strides = array<i32>} : memref<1x2x16x128xf32, #tpu.memory_space<vmem>>, vector<1x2x1x128xf32>,
    %c0_73 = arith.constant 0 : index
    %c0_74 = arith.constant 0 : index
    %c9 = arith.constant 9 : index
    %c0_75 = arith.constant 0 : index
    %72 = vector.load %arg1[%c0_73, %c0_74, %c9, %c0_75] : memref<1x2x16x128xf32, #tpu.memory_space<vmem>>, vector<1x2x1x128xf32>
    %73 = vector.shape_cast %72 : vector<1x2x1x128xf32> to vector<2x128xf32>
    %cst_76 = arith.constant dense<0.000000e+00> : vector<2x128xf32>
    %74 = tpu.matmul %68, %1, %cst_76 {dimension_numbers = #tpu.dot_dimension_numbers<[1], [0], [0], [1], [0, 0, 1, 1], [], []>} : vector<2x128xf32>, vector<128x128xf32>, vector<2x128xf32> -> vector<2x128xf32>
    %75 = arith.addf %73, %74 : vector<2x128xf32>
    %76 = math.tanh %75 : vector<2x128xf32>
    %c0_77 = arith.constant 0 : index
    %c0_78 = arith.constant 0 : index
    %c9_79 = arith.constant 9 : index
    %c0_80 = arith.constant 0 : index
    %77 = vector.load %arg3[%c0_77, %c0_78, %c9_79, %c0_80] : memref<1x2x16x128xf32, #tpu.memory_space<vmem>>, vector<1x2x1x128xf32>
    %78 = vector.shape_cast %77 : vector<1x2x1x128xf32> to vector<2x128xf32>
    %79 = vector.shape_cast %76 : vector<2x128xf32> to vector<1x2x1x128xf32>
    tpu.vector_store %arg3[%c0_77, %c0_78, %c9_79, %c0_80], %79 {strides = array<i32>} : memref<1x2x16x128xf32, #tpu.memory_space<vmem>>, vector<1x2x1x128xf32>,
    %c0_81 = arith.constant 0 : index
    %c0_82 = arith.constant 0 : index
    %c10 = arith.constant 10 : index
    %c0_83 = arith.constant 0 : index
    %80 = vector.load %arg1[%c0_81, %c0_82, %c10, %c0_83] : memref<1x2x16x128xf32, #tpu.memory_space<vmem>>, vector<1x2x1x128xf32>
    %81 = vector.shape_cast %80 : vector<1x2x1x128xf32> to vector<2x128xf32>
    %cst_84 = arith.constant dense<0.000000e+00> : vector<2x128xf32>
    %82 = tpu.matmul %76, %1, %cst_84 {dimension_numbers = #tpu.dot_dimension_numbers<[1], [0], [0], [1], [0, 0, 1, 1], [], []>} : vector<2x128xf32>, vector<128x128xf32>, vector<2x128xf32> -> vector<2x128xf32>
    %83 = arith.addf %81, %82 : vector<2x128xf32>
    %84 = math.tanh %83 : vector<2x128xf32>
    %c0_85 = arith.constant 0 : index
    %c0_86 = arith.constant 0 : index
    %c10_87 = arith.constant 10 : index
    %c0_88 = arith.constant 0 : index
    %85 = vector.load %arg3[%c0_85, %c0_86, %c10_87, %c0_88] : memref<1x2x16x128xf32, #tpu.memory_space<vmem>>, vector<1x2x1x128xf32>
    %86 = vector.shape_cast %85 : vector<1x2x1x128xf32> to vector<2x128xf32>
    %87 = vector.shape_cast %84 : vector<2x128xf32> to vector<1x2x1x128xf32>
    tpu.vector_store %arg3[%c0_85, %c0_86, %c10_87, %c0_88], %87 {strides = array<i32>} : memref<1x2x16x128xf32, #tpu.memory_space<vmem>>, vector<1x2x1x128xf32>,
    %c0_89 = arith.constant 0 : index
    %c0_90 = arith.constant 0 : index
    %c11 = arith.constant 11 : index
    %c0_91 = arith.constant 0 : index
    %88 = vector.load %arg1[%c0_89, %c0_90, %c11, %c0_91] : memref<1x2x16x128xf32, #tpu.memory_space<vmem>>, vector<1x2x1x128xf32>
    %89 = vector.shape_cast %88 : vector<1x2x1x128xf32> to vector<2x128xf32>
    %cst_92 = arith.constant dense<0.000000e+00> : vector<2x128xf32>
    %90 = tpu.matmul %84, %1, %cst_92 {dimension_numbers = #tpu.dot_dimension_numbers<[1], [0], [0], [1], [0, 0, 1, 1], [], []>} : vector<2x128xf32>, vector<128x128xf32>, vector<2x128xf32> -> vector<2x128xf32>
    %91 = arith.addf %89, %90 : vector<2x128xf32>
    %92 = math.tanh %91 : vector<2x128xf32>
    %c0_93 = arith.constant 0 : index
    %c0_94 = arith.constant 0 : index
    %c11_95 = arith.constant 11 : index
    %c0_96 = arith.constant 0 : index
    %93 = vector.load %arg3[%c0_93, %c0_94, %c11_95, %c0_96] : memref<1x2x16x128xf32, #tpu.memory_space<vmem>>, vector<1x2x1x128xf32>
    %94 = vector.shape_cast %93 : vector<1x2x1x128xf32> to vector<2x128xf32>
    %95 = vector.shape_cast %92 : vector<2x128xf32> to vector<1x2x1x128xf32>
    tpu.vector_store %arg3[%c0_93, %c0_94, %c11_95, %c0_96], %95 {strides = array<i32>} : memref<1x2x16x128xf32, #tpu.memory_space<vmem>>, vector<1x2x1x128xf32>,
    %c0_97 = arith.constant 0 : index
    %c0_98 = arith.constant 0 : index
    %c12 = arith.constant 12 : index
    %c0_99 = arith.constant 0 : index
    %96 = vector.load %arg1[%c0_97, %c0_98, %c12, %c0_99] : memref<1x2x16x128xf32, #tpu.memory_space<vmem>>, vector<1x2x1x128xf32>
    %97 = vector.shape_cast %96 : vector<1x2x1x128xf32> to vector<2x128xf32>
    %cst_100 = arith.constant dense<0.000000e+00> : vector<2x128xf32>
    %98 = tpu.matmul %92, %1, %cst_100 {dimension_numbers = #tpu.dot_dimension_numbers<[1], [0], [0], [1], [0, 0, 1, 1], [], []>} : vector<2x128xf32>, vector<128x128xf32>, vector<2x128xf32> -> vector<2x128xf32>
    %99 = arith.addf %97, %98 : vector<2x128xf32>
    %100 = math.tanh %99 : vector<2x128xf32>
    %c0_101 = arith.constant 0 : index
    %c0_102 = arith.constant 0 : index
    %c12_103 = arith.constant 12 : index
    %c0_104 = arith.constant 0 : index
    %101 = vector.load %arg3[%c0_101, %c0_102, %c12_103, %c0_104] : memref<1x2x16x128xf32, #tpu.memory_space<vmem>>, vector<1x2x1x128xf32>
    %102 = vector.shape_cast %101 : vector<1x2x1x128xf32> to vector<2x128xf32>
    %103 = vector.shape_cast %100 : vector<2x128xf32> to vector<1x2x1x128xf32>
    tpu.vector_store %arg3[%c0_101, %c0_102, %c12_103, %c0_104], %103 {strides = array<i32>} : memref<1x2x16x128xf32, #tpu.memory_space<vmem>>, vector<1x2x1x128xf32>,
    %c0_105 = arith.constant 0 : index
    %c0_106 = arith.constant 0 : index
    %c13 = arith.constant 13 : index
    %c0_107 = arith.constant 0 : index
    %104 = vector.load %arg1[%c0_105, %c0_106, %c13, %c0_107] : memref<1x2x16x128xf32, #tpu.memory_space<vmem>>, vector<1x2x1x128xf32>
    %105 = vector.shape_cast %104 : vector<1x2x1x128xf32> to vector<2x128xf32>
    %cst_108 = arith.constant dense<0.000000e+00> : vector<2x128xf32>
    %106 = tpu.matmul %100, %1, %cst_108 {dimension_numbers = #tpu.dot_dimension_numbers<[1], [0], [0], [1], [0, 0, 1, 1], [], []>} : vector<2x128xf32>, vector<128x128xf32>, vector<2x128xf32> -> vector<2x128xf32>
    %107 = arith.addf %105, %106 : vector<2x128xf32>
    %108 = math.tanh %107 : vector<2x128xf32>
    %c0_109 = arith.constant 0 : index
    %c0_110 = arith.constant 0 : index
    %c13_111 = arith.constant 13 : index
    %c0_112 = arith.constant 0 : index
    %109 = vector.load %arg3[%c0_109, %c0_110, %c13_111, %c0_112] : memref<1x2x16x128xf32, #tpu.memory_space<vmem>>, vector<1x2x1x128xf32>
    %110 = vector.shape_cast %109 : vector<1x2x1x128xf32> to vector<2x128xf32>
    %111 = vector.shape_cast %108 : vector<2x128xf32> to vector<1x2x1x128xf32>
    tpu.vector_store %arg3[%c0_109, %c0_110, %c13_111, %c0_112], %111 {strides = array<i32>} : memref<1x2x16x128xf32, #tpu.memory_space<vmem>>, vector<1x2x1x128xf32>,
    %c0_113 = arith.constant 0 : index
    %c0_114 = arith.constant 0 : index
    %c14 = arith.constant 14 : index
    %c0_115 = arith.constant 0 : index
    %112 = vector.load %arg1[%c0_113, %c0_114, %c14, %c0_115] : memref<1x2x16x128xf32, #tpu.memory_space<vmem>>, vector<1x2x1x128xf32>
    %113 = vector.shape_cast %112 : vector<1x2x1x128xf32> to vector<2x128xf32>
    %cst_116 = arith.constant dense<0.000000e+00> : vector<2x128xf32>
    %114 = tpu.matmul %108, %1, %cst_116 {dimension_numbers = #tpu.dot_dimension_numbers<[1], [0], [0], [1], [0, 0, 1, 1], [], []>} : vector<2x128xf32>, vector<128x128xf32>, vector<2x128xf32> -> vector<2x128xf32>
    %115 = arith.addf %113, %114 : vector<2x128xf32>
    %116 = math.tanh %115 : vector<2x128xf32>
    %c0_117 = arith.constant 0 : index
    %c0_118 = arith.constant 0 : index
    %c14_119 = arith.constant 14 : index
    %c0_120 = arith.constant 0 : index
    %117 = vector.load %arg3[%c0_117, %c0_118, %c14_119, %c0_120] : memref<1x2x16x128xf32, #tpu.memory_space<vmem>>, vector<1x2x1x128xf32>
    %118 = vector.shape_cast %117 : vector<1x2x1x128xf32> to vector<2x128xf32>
    %119 = vector.shape_cast %116 : vector<2x128xf32> to vector<1x2x1x128xf32>
    tpu.vector_store %arg3[%c0_117, %c0_118, %c14_119, %c0_120], %119 {strides = array<i32>} : memref<1x2x16x128xf32, #tpu.memory_space<vmem>>, vector<1x2x1x128xf32>,
    %c0_121 = arith.constant 0 : index
    %c0_122 = arith.constant 0 : index
    %c15 = arith.constant 15 : index
    %c0_123 = arith.constant 0 : index
    %120 = vector.load %arg1[%c0_121, %c0_122, %c15, %c0_123] : memref<1x2x16x128xf32, #tpu.memory_space<vmem>>, vector<1x2x1x128xf32>
    %121 = vector.shape_cast %120 : vector<1x2x1x128xf32> to vector<2x128xf32>
    %cst_124 = arith.constant dense<0.000000e+00> : vector<2x128xf32>
    %122 = tpu.matmul %116, %1, %cst_124 {dimension_numbers = #tpu.dot_dimension_numbers<[1], [0], [0], [1], [0, 0, 1, 1], [], []>} : vector<2x128xf32>, vector<128x128xf32>, vector<2x128xf32> -> vector<2x128xf32>
    %123 = arith.addf %121, %122 : vector<2x128xf32>
    %124 = math.tanh %123 : vector<2x128xf32>
    %c0_125 = arith.constant 0 : index
    %c0_126 = arith.constant 0 : index
    %c15_127 = arith.constant 15 : index
    %c0_128 = arith.constant 0 : index
    %125 = vector.load %arg3[%c0_125, %c0_126, %c15_127, %c0_128] : memref<1x2x16x128xf32, #tpu.memory_space<vmem>>, vector<1x2x1x128xf32>
    %126 = vector.shape_cast %125 : vector<1x2x1x128xf32> to vector<2x128xf32>
    %127 = vector.shape_cast %124 : vector<2x128xf32> to vector<1x2x1x128xf32>
    tpu.vector_store %arg3[%c0_125, %c0_126, %c15_127, %c0_128], %127 {strides = array<i32>} : memref<1x2x16x128xf32, #tpu.memory_space<vmem>>, vector<1x2x1x128xf32>,
    return
  }
  func.func @transform_0(%arg0: i32) -> (i32, i32, i32, i32) {
    %c0_i32 = arith.constant 0 : i32
    %c0_i32_0 = arith.constant 0 : i32
    %c0_i32_1 = arith.constant 0 : i32
    %c0_i32_2 = arith.constant 0 : i32
    return %arg0, %c0_i32, %c0_i32_0, %c0_i32_1 : i32, i32, i32, i32
  }
  func.func @transform_1(%arg0: i32) -> (i32, i32, i32) {
    %c0_i32 = arith.constant 0 : i32
    %c0_i32_0 = arith.constant 0 : i32
    %c0_i32_1 = arith.constant 0 : i32
    return %arg0, %c0_i32, %c0_i32_0 : i32, i32, i32
  }
  func.func @transform_2(%arg0: i32) -> (i32, i32, i32, i32) {
    %c0_i32 = arith.constant 0 : i32
    %c0_i32_0 = arith.constant 0 : i32
    %c0_i32_1 = arith.constant 0 : i32
    %c0_i32_2 = arith.constant 0 : i32
    return %arg0, %c0_i32, %c0_i32_0, %c0_i32_1 : i32, i32, i32, i32
  }
}

module attributes {stable_mosaic.version = 11 : i64} {
  func.func @logits_kernel(%arg0: i32, %arg1: memref<2x16x128xf32, #tpu.memory_space<vmem>>, %arg2: memref<2x128xf32, #tpu.memory_space<vmem>>, %arg3: memref<128x256xf32, #tpu.memory_space<vmem>>, %arg4: memref<2x16xf32, #tpu.memory_space<vmem>>, %arg5: memref<2x16xf32, #tpu.memory_space<vmem>>, %arg6: memref<2x16xf32, #tpu.memory_space<vmem>>, %arg7: memref<2x16xf32, #tpu.memory_space<vmem>>, %arg8: memref<2x16xf32, #tpu.memory_space<vmem>>) attributes {dimension_semantics = [#tpu.dimension_semantics<arbitrary>], iteration_bounds = array<i64: 1>, scalar_prefetch = 0 : i64, scratch_operands = 0 : i64, tpu.core_type = #tpu.core_type<tc>, window_params = [{pipeline_mode = #tpu.pipeline_mode<synchronous>, transform_indices = @transform_0, window_bounds = array<i64: 2, 16, 128>}, {pipeline_mode = #tpu.pipeline_mode<synchronous>, transform_indices = @transform_1, window_bounds = array<i64: 2, 128>}, {pipeline_mode = #tpu.pipeline_mode<synchronous>, transform_indices = @transform_2, window_bounds = array<i64: 128, 256>}, {pipeline_mode = #tpu.pipeline_mode<synchronous>, transform_indices = @transform_3, window_bounds = array<i64: 2, 16>}, {pipeline_mode = #tpu.pipeline_mode<synchronous>, transform_indices = @transform_4, window_bounds = array<i64: 2, 16>}, {pipeline_mode = #tpu.pipeline_mode<synchronous>, transform_indices = @transform_5, window_bounds = array<i64: 2, 16>}, {pipeline_mode = #tpu.pipeline_mode<synchronous>, transform_indices = @transform_6, window_bounds = array<i64: 2, 16>}, {pipeline_mode = #tpu.pipeline_mode<synchronous>, transform_indices = @transform_7, window_bounds = array<i64: 2, 16>}]} {
    %c0 = arith.constant 0 : index
    %c0_0 = arith.constant 0 : index
    %c0_1 = arith.constant 0 : index
    %0 = vector.load %arg1[%c0, %c0_0, %c0_1] : memref<2x16x128xf32, #tpu.memory_space<vmem>>, vector<2x16x128xf32>
    %c0_2 = arith.constant 0 : index
    %c0_3 = arith.constant 0 : index
    %1 = vector.load %arg2[%c0_2, %c0_3] : memref<2x128xf32, #tpu.memory_space<vmem>>, vector<2x128xf32>
    %c0_4 = arith.constant 0 : index
    %c0_5 = arith.constant 0 : index
    %2 = vector.load %arg4[%c0_4, %c0_5] : memref<2x16xf32, #tpu.memory_space<vmem>>, vector<2x16xf32>
    %c0_6 = arith.constant 0 : index
    %c0_7 = arith.constant 0 : index
    %3 = vector.load %arg3[%c0_6, %c0_7] : memref<128x256xf32, #tpu.memory_space<vmem>>, vector<128x256xf32>
    %cst = arith.constant dense<0.000000e+00> : vector<2x256xf32>
    %4 = tpu.matmul %1, %3, %cst {dimension_numbers = #tpu.dot_dimension_numbers<[1], [0], [0], [1], [0, 0, 1, 1], [], []>} : vector<2x128xf32>, vector<128x256xf32>, vector<2x256xf32> -> vector<2x256xf32>
    %5 = vector.extract_strided_slice %4 {offsets = [0, 0], sizes = [2, 128], strides = [1, 1]} : vector<2x256xf32> to vector<2x128xf32>
    %6 = vector.extract_strided_slice %4 {offsets = [0, 128], sizes = [2, 128], strides = [1, 1]} : vector<2x256xf32> to vector<2x128xf32>
    %7 = vector.shape_cast %5 : vector<2x128xf32> to vector<2x1x128xf32>
    %8 = vector.broadcast %7 : vector<2x1x128xf32> to vector<2x16x128xf32>
    %9 = arith.mulf %0, %8 : vector<2x16x128xf32>
    %cst_8 = arith.constant dense<0.000000e+00> : vector<2x16xf32>
    %10 = vector.multi_reduction <add>, %9, %cst_8 [2] : vector<2x16x128xf32> to vector<2x16xf32>
    %11 = vector.shape_cast %6 : vector<2x128xf32> to vector<2x1x128xf32>
    %12 = vector.broadcast %11 : vector<2x1x128xf32> to vector<2x16x128xf32>
    %13 = arith.mulf %0, %12 : vector<2x16x128xf32>
    %cst_9 = arith.constant dense<0.000000e+00> : vector<2x16xf32>
    %14 = vector.multi_reduction <add>, %13, %cst_9 [2] : vector<2x16x128xf32> to vector<2x16xf32>
    %cst_10 = arith.constant 0.000000e+00 : f32
    %15 = vector.broadcast %cst_10 : f32 to vector<2x16xf32>
    %16 = arith.cmpf ogt, %2, %15 : vector<2x16xf32>
    %cst_11 = arith.constant -1.000000e+07 : f32
    %17 = vector.broadcast %cst_11 : f32 to vector<2x16xf32>
    %18 = arith.select %16, %10, %17 : vector<2x16xi1>, vector<2x16xf32>
    %cst_12 = arith.constant 0.000000e+00 : f32
    %19 = vector.broadcast %cst_12 : f32 to vector<2x16xf32>
    %20 = arith.cmpf ogt, %2, %19 : vector<2x16xf32>
    %cst_13 = arith.constant -1.000000e+07 : f32
    %21 = vector.broadcast %cst_13 : f32 to vector<2x16xf32>
    %22 = arith.select %20, %14, %21 : vector<2x16xi1>, vector<2x16xf32>
    %c0_14 = arith.constant 0 : index
    %c0_15 = arith.constant 0 : index
    %23 = vector.load %arg5[%c0_14, %c0_15] : memref<2x16xf32, #tpu.memory_space<vmem>>, vector<2x16xf32>
    tpu.vector_store %arg5[%c0_14, %c0_15], %18 {strides = array<i32>} : memref<2x16xf32, #tpu.memory_space<vmem>>, vector<2x16xf32>,
    %c0_16 = arith.constant 0 : index
    %c0_17 = arith.constant 0 : index
    %24 = vector.load %arg6[%c0_16, %c0_17] : memref<2x16xf32, #tpu.memory_space<vmem>>, vector<2x16xf32>
    tpu.vector_store %arg6[%c0_16, %c0_17], %22 {strides = array<i32>} : memref<2x16xf32, #tpu.memory_space<vmem>>, vector<2x16xf32>,
    %cst_18 = arith.constant dense<0xFF800000> : vector<2xf32>
    %25 = vector.multi_reduction <maximumf>, %18, %cst_18 [1] : vector<2x16xf32> to vector<2xf32>
    %26 = vector.shape_cast %25 : vector<2xf32> to vector<2x1xf32>
    %27 = vector.broadcast %26 : vector<2x1xf32> to vector<2x16xf32>
    %28 = arith.subf %18, %27 : vector<2x16xf32>
    %29 = math.exp %28 : vector<2x16xf32>
    %cst_19 = arith.constant dense<0.000000e+00> : vector<2xf32>
    %30 = vector.multi_reduction <add>, %29, %cst_19 [1] : vector<2x16xf32> to vector<2xf32>
    %31 = vector.shape_cast %30 : vector<2xf32> to vector<2x1xf32>
    %32 = math.log %31 : vector<2x1xf32>
    %33 = arith.addf %32, %26 : vector<2x1xf32>
    %34 = vector.broadcast %33 : vector<2x1xf32> to vector<2x16xf32>
    %35 = arith.subf %18, %34 : vector<2x16xf32>
    %c0_20 = arith.constant 0 : index
    %c0_21 = arith.constant 0 : index
    %36 = vector.load %arg7[%c0_20, %c0_21] : memref<2x16xf32, #tpu.memory_space<vmem>>, vector<2x16xf32>
    tpu.vector_store %arg7[%c0_20, %c0_21], %35 {strides = array<i32>} : memref<2x16xf32, #tpu.memory_space<vmem>>, vector<2x16xf32>,
    %cst_22 = arith.constant dense<0xFF800000> : vector<2xf32>
    %37 = vector.multi_reduction <maximumf>, %22, %cst_22 [1] : vector<2x16xf32> to vector<2xf32>
    %38 = vector.shape_cast %37 : vector<2xf32> to vector<2x1xf32>
    %39 = vector.broadcast %38 : vector<2x1xf32> to vector<2x16xf32>
    %40 = arith.subf %22, %39 : vector<2x16xf32>
    %41 = math.exp %40 : vector<2x16xf32>
    %cst_23 = arith.constant dense<0.000000e+00> : vector<2xf32>
    %42 = vector.multi_reduction <add>, %41, %cst_23 [1] : vector<2x16xf32> to vector<2xf32>
    %43 = vector.shape_cast %42 : vector<2xf32> to vector<2x1xf32>
    %44 = math.log %43 : vector<2x1xf32>
    %45 = arith.addf %44, %38 : vector<2x1xf32>
    %46 = vector.broadcast %45 : vector<2x1xf32> to vector<2x16xf32>
    %47 = arith.subf %22, %46 : vector<2x16xf32>
    %c0_24 = arith.constant 0 : index
    %c0_25 = arith.constant 0 : index
    %48 = vector.load %arg8[%c0_24, %c0_25] : memref<2x16xf32, #tpu.memory_space<vmem>>, vector<2x16xf32>
    tpu.vector_store %arg8[%c0_24, %c0_25], %47 {strides = array<i32>} : memref<2x16xf32, #tpu.memory_space<vmem>>, vector<2x16xf32>,
    return
  }
  func.func @transform_0(%arg0: i32) -> (i32, i32, i32) {
    %c0_i32 = arith.constant 0 : i32
    %c0_i32_0 = arith.constant 0 : i32
    %c0_i32_1 = arith.constant 0 : i32
    %c0_i32_2 = arith.constant 0 : i32
    return %c0_i32, %c0_i32_0, %c0_i32_1 : i32, i32, i32
  }
  func.func @transform_1(%arg0: i32) -> (i32, i32) {
    %c0_i32 = arith.constant 0 : i32
    %c0_i32_0 = arith.constant 0 : i32
    %c0_i32_1 = arith.constant 0 : i32
    return %c0_i32, %c0_i32_0 : i32, i32
  }
  func.func @transform_2(%arg0: i32) -> (i32, i32) {
    %c0_i32 = arith.constant 0 : i32
    %c0_i32_0 = arith.constant 0 : i32
    %c0_i32_1 = arith.constant 0 : i32
    return %c0_i32, %c0_i32_0 : i32, i32
  }
  func.func @transform_3(%arg0: i32) -> (i32, i32) {
    %c0_i32 = arith.constant 0 : i32
    %c0_i32_0 = arith.constant 0 : i32
    %c0_i32_1 = arith.constant 0 : i32
    return %c0_i32, %c0_i32_0 : i32, i32
  }
  func.func @transform_4(%arg0: i32) -> (i32, i32) {
    %c0_i32 = arith.constant 0 : i32
    %c0_i32_0 = arith.constant 0 : i32
    %c0_i32_1 = arith.constant 0 : i32
    return %c0_i32, %c0_i32_0 : i32, i32
  }
  func.func @transform_5(%arg0: i32) -> (i32, i32) {
    %c0_i32 = arith.constant 0 : i32
    %c0_i32_0 = arith.constant 0 : i32
    %c0_i32_1 = arith.constant 0 : i32
    return %c0_i32, %c0_i32_0 : i32, i32
  }
  func.func @transform_6(%arg0: i32) -> (i32, i32) {
    %c0_i32 = arith.constant 0 : i32
    %c0_i32_0 = arith.constant 0 : i32
    %c0_i32_1 = arith.constant 0 : i32
    return %c0_i32, %c0_i32_0 : i32, i32
  }
  func.func @transform_7(%arg0: i32) -> (i32, i32) {
    %c0_i32 = arith.constant 0 : i32
    %c0_i32_0 = arith.constant 0 : i32
    %c0_i32_1 = arith.constant 0 : i32
    return %c0_i32, %c0_i32_0 : i32, i32
  }
}

</mosaic_0001>

<bundles_post_ra>
// kernel: rnn_rc_forward.3
= control target key start
LH: loop header
LB: loop body
LE: loop exit
PB: predicated region body
PF: predicated region fallthrough
CT: control target
= control target key end

     0   :  { %13 = vsyncpa [#allocation3], 0  ;;  %s741_s0 = inlined_call_operand.vmem [shape: f32[2,16,128], index: 0, kind: input, shape index: {}]   ;;  %s742_s1 = inlined_call_operand.vmem [shape: f32[2,128], index: 1, kind: input, shape index: {}]   ;;  %s743_s2 = inlined_call_operand.vmem [shape: f32[128,256], index: 2, kind: input, shape index: {}]   ;;  %s744_s3 = inlined_call_operand.vmem [shape: f32[2,16], index: 3, kind: input, shape index: {}]   ;;  %s745_s4 = inlined_call_operand.hbm [shape: f32[2,16], index: 4, kind: output, shape index: {0}]   ;;  %s746_s5 = inlined_call_operand.hbm [shape: f32[2,16], index: 5, kind: output, shape index: {1}]   ;;  %s747_s6 = inlined_call_operand.hbm [shape: f32[2,16], index: 6, kind: output, shape index: {2}]   ;;  %s748_s7 = inlined_call_operand.hbm [shape: f32[2,16], index: 7, kind: output, shape index: {3}]  }
   0x1   :  { %14 = vsyncpa [#allocation5], 0  ;;  %v31_v0 = vld [vmem:[%s743_s2 + $0x8] sm:$0xff]  ;;  %v33_v1 = vld [vmem:[%s743_s2 + $0x18] sm:$0xff]  ;;  %v505_v7 = vmov 0.0  }
   0x2   :  { %v30_v2 = vld [vmem:[%s743_s2] sm:$0xff]  ;;  %v365_v3 = vpack.c.bf16 %v33_v1, %v31_v0  ;;  %v32_v4 = vld [vmem:[%s743_s2 + $0x10] sm:$0xff]  ;;  %v35_v5 = vld [vmem:[%s743_s2 + $0x28] sm:$0xff]  ;;  %126 = vmatprep.mubr.f32.mxu0 %v505_v7 }
   0x3   :  { %v37_v6 = vld [vmem:[%s743_s2 + $0x38] sm:$0xff]  ;;  %v367_v8 = vpack.c.bf16 %v32_v4, %v30_v2  ;;  %v34_v10 = vld [vmem:[%s743_s2 + $0x20] sm:$0xff]  ;;  %v36_v11 = vld [vmem:[%s743_s2 + $0x30] sm:$0xff] }
   0x4   :  { %v369_v9 = vpack.c.bf16 %v37_v6, %v35_v5  ;;  %v39_v12 = vld [vmem:[%s743_s2 + $0x48] sm:$0xff]  ;;  %366 = vmatprep.subr.bf16.mxu0 %v365_v3  ;;  %v41_v13 = vld [vmem:[%s743_s2 + $0x58] sm:$0xff]  ;;  %v371_v14 = vpack.c.bf16 %v36_v11, %v34_v10  ;;  %v38_v16 = vld [vmem:[%s743_s2 + $0x40] sm:$0xff] }
   0x5   :  { %368 = vmatpush1.bf16.msra.mxu0 %v367_v8  ;;  %v373_v15 = vpack.c.bf16 %v41_v13, %v39_v12  ;;  %v40_v17 = vld [vmem:[%s743_s2 + $0x50] sm:$0xff]  ;;  %v43_v18 = vld [vmem:[%s743_s2 + $0x68] sm:$0xff]  ;;  %v45_v19 = vld [vmem:[%s743_s2 + $0x78] sm:$0xff] }
   0x6   :  { %370 = vmatprep.subr.bf16.mxu0 %v369_v9  ;;  %v375_v20 = vpack.c.bf16 %v40_v17, %v38_v16  ;;  %v377_v21 = vpack.c.bf16 %v45_v19, %v43_v18  ;;  %v42_v22 = vld [vmem:[%s743_s2 + $0x60] sm:$0xff]  ;;  %v44_v23 = vld [vmem:[%s743_s2 + $0x70] sm:$0xff]  ;;  %v47_v24 = vld [vmem:[%s743_s2 + $0x88] sm:$0xff] }
   0x7   :  { %v49_v25 = vld [vmem:[%s743_s2 + $0x98] sm:$0xff] }
   0x9   :  { %372 = vmatpush1.bf16.msra.mxu0 %v371_v14 }
   0xa   :  { %374 = vmatprep.subr.bf16.mxu0 %v373_v15 }
   0xb   :  { %15 = vsyncpa [#allocation8], 0  ;;  %v379_v26 = vpack.c.bf16 %v44_v23, %v42_v22  ;;  %v381_v27 = vpack.c.bf16 %v49_v25, %v47_v24  ;;  %v46_v28 = vld [vmem:[%s743_s2 + $0x80] sm:$0xff]  ;;  %v48_v29 = vld [vmem:[%s743_s2 + $0x90] sm:$0xff]  ;;  %v506_v50 = vmov 1966171168   ;;  %v137_v52 = vlaneseq }
   0xc   :  { %v51_v30 = vld [vmem:[%s743_s2 + $0xa8] sm:$0xff]  ;;  %v53_v31 = vld [vmem:[%s743_s2 + $0xb8] sm:$0xff]  ;;  %v383_v32 = vpack.c.bf16 %v48_v29, %v46_v28  ;;  %v50_v34 = vld [vmem:[%s743_s2 + $0xa0] sm:$0xff]  ;;  %v135_v51 = vunpack.c.l.s4 %v506_v50  ;;  %vm239_vm0 = vcmask 130112   ;;  %vm250_vm1 = vcmask 1041409   ;;  %s508_s29 = smov [#allocation2]  }
   0xd   :  { %376 = vmatpush1.bf16.msra.mxu0 %v375_v20  ;;  %v385_v33 = vpack.c.bf16 %v53_v31, %v51_v30  ;;  %v52_v35 = vld [vmem:[%s743_s2 + $0xb0] sm:$0xff]  ;;  %v55_v36 = vld [vmem:[%s743_s2 + $0xc8] sm:$0xff]  ;;  %v57_v37 = vld [vmem:[%s743_s2 + $0xd8] sm:$0xff]  ;;  %v138_v54 = vshrl.u32 %v137_v52, 7  ;;  %v229_v19 = vand.u32 127, %v137_v52  ;;  %vm279_vm3 = vcmask 123904  }
   0xe   :  { %378 = vmatprep.subr.bf16.mxu0 %v377_v21  ;;  %v387_v38 = vpack.c.bf16 %v52_v35, %v50_v34  ;;  %v389_v39 = vpack.c.bf16 %v57_v37, %v55_v36  ;;  %v54_v40 = vld [vmem:[%s743_s2 + $0xc0] sm:$0xff]  ;;  %v56_v41 = vld [vmem:[%s743_s2 + $0xd0] sm:$0xff]  ;;  %v59_v42 = vld [vmem:[%s743_s2 + $0xe8] sm:$0xff]  ;;  %v136_v53 = vunpack.c.0.s8 %v135_v51  ;;  %s316_s30 = sshll.u32 %s508_s29, 4  ;;  %s317_s30 = int_to_ptr.vmem [resolvable:$true] %s316_s30 }
   0xf   :  { %v61_v43 = vld [vmem:[%s743_s2 + $0xf8] sm:$0xff]  ;;  %v391_v44 = vpack.c.bf16 %v56_v41, %v54_v40  ;;  %v58_v46 = vld [vmem:[%s743_s2 + $0xe0] sm:$0xff]  ;;  %v60_v47 = vld [vmem:[%s743_s2 + $0xf0] sm:$0xff]  ;;  %v158_v59 = vsub.s32 0, %v138_v54  ;;  %v234_v22 = vadd.s32 4294967288, %v229_v19  ;;  %v232_v25 = vsub.s32 %v229_v19, %v138_v54 }
  0x10   :  { %v393_v45 = vpack.c.bf16 %v61_v43, %v59_v42  ;;  %v395_v48 = vpack.c.bf16 %v60_v47, %v58_v46  ;;  %v28_v49 = vld [vmem:[%s742_s1] sm:$0x3]  ;;  %v139_v55 = vsub.s32 %v136_v53, %v138_v54  ;;  %v25_v3 = vld [vmem:[%s741_s0 + $0x8] sm:$0xff]  ;;  %v26_v9 = vld [vmem:[%s741_s0 + $0x10] sm:$0xff] }
  0x11   :  { %380 = vmatpush1.bf16.msra.mxu0 %v379_v26  ;;  %v24_v0 = vld [vmem:[%s741_s0] sm:$0xff]  ;;  %v27_v13 = vld [vmem:[%s741_s0 + $0x18] sm:$0xff]  ;;  %v237_v26 = vsub.s32 %v234_v22, %v138_v54 }
  0x12   :  { %382 = vmatprep.subr.bf16.mxu0 %v381_v27  ;;  %v29_v29 = vld [vmem:[%s744_s3] sm:$0x3]  ;;  %s507_s3 = smov [#allocation4]  }
  0x13   :  { %vm223_vm2 = vcmp.gt.f32.partialorder %v29_v29, 0.0  ;;  %s326_s28 = sshll.u32 %s507_s3, 4  ;;  %s327_s28 = int_to_ptr.vmem [resolvable:$true] %s326_s28 }
  0x14   :  { %s411_s8 = scalar_lea.vmem %s327_s28, 32  ;;  %p416_p1 = scmp.lt.s32.totalorder %s327_s28, %s327_s28 }
  0x15   :  { %384 = vmatpush1.bf16.msra.mxu0 %v383_v32  ;;  %p412_p0 = scmp.ne.s32.totalorder %s327_s28, %s411_s8  ;;  %p417_p2 = scmp.lt.s32.totalorder %s411_s8, %s411_s8 }
  0x16   :  { %386 = vmatprep.subr.bf16.mxu0 %v385_v33 }
  0x17   :  { %p418_p3 = por %p417_p2, %p416_p1 }
  0x19   :  { %388 = vmatpush1.bf16.msra.mxu0 %v387_v38  ;;  %p419_p4 = pnand %p418_p3, %p412_p0 }
  0x1a   :  { %390 = vmatprep.subr.bf16.mxu0 %v389_v39 }
  0x1d   :  { %392 = vmatpush1.bf16.msra.mxu0 %v391_v44 }
  0x1e   :  { %394 = vmatprep.subr.bf16.mxu0 %v393_v45 }
  0x21   :  { %396 = vmatpush1.bf16.msra.mxu0 %v395_v48 }
  0x24   :  { %127 = vmatmul.mubr.f32.vlgmr.msra.gmra.mrb[0].mxu0 %v28_v49 }
  0xf7   :  { %v128_v56 = vpop.f32.mrb[0].mxu0 }
  0xf8   :  { %v140_v57 = vrot.slane %v128_v56, %v139_v55  ;;  %v130_v58 = vpop.f32.mrb[1].mxu0 }
  0xf9   :  { %v185_v60 = vrot.slane %v130_v58, %v139_v55 }
  0xfa   :  { %v141_v61 = vcombine.high %v140_v57, %v140_v57  ;;  %v148_v62 = vrot.slane %v140_v57, %v139_v55 }
  0xfb   :  { %v193_v63 = vrot.slane %v185_v60, %v139_v55  ;;  %v186_v5 = vcombine.high %v185_v60, %v185_v60 }
  0xfc   :  { %v155_v1 = vrot.slane %v141_v61, %v139_v55  ;;  %v159_v2 = vrot.slane %v148_v62, %v158_v59 }
  0xfd   :  { %v204_v4 = vrot.slane %v193_v63, %v158_v59  ;;  %v200_v10 = vrot.slane %v186_v5, %v139_v55 }
  0xfe   :  { %v166_v6 = vmul.f32 %v159_v2, %v24_v0  ;;  %v163_v8 = vrot.slane %v155_v1, %v158_v59  ;;  %v167_v11 = vmul.f32 %v159_v2, %v25_v3 }
  0xff   :  { %v212_v7 = vmul.f32 %v204_v4, %v25_v3  ;;  %v211_v14 = vmul.f32 %v204_v4, %v24_v0  ;;  %v208_v15 = vrot.slane %v200_v10, %v158_v59 }
 0x100   :  { %170 = vadd.xlane.f32.xlu0 %v166_v6  ;;  %v168_v12 = vmul.f32 %v163_v8, %v26_v9  ;;  %v169_v16 = vmul.f32 %v163_v8, %v27_v13 }
 0x101   :  { %217 = vadd.xlane.f32.xlu1 %v212_v7  ;;  %v213_v17 = vmul.f32 %v208_v15, %v26_v9  ;;  %v214_v18 = vmul.f32 %v208_v15, %v27_v13 }
 0x104   :  { %172 = vadd.xlane.f32.xlu0 %v167_v11 }
 0x105   :  { %174 = vadd.xlane.f32.xlu1 %v168_v12 }
 0x108   :  { %215 = vadd.xlane.f32.xlu0 %v211_v14 }
 0x109   :  { %176 = vadd.xlane.f32.xlu1 %v169_v16 }
 0x10c   :  { %219 = vadd.xlane.f32.xlu0 %v213_v17 }
 0x10d   :  { %221 = vadd.xlane.f32.xlu1 %v214_v18 }
 0x18d   :  { %v171_v20 = vpop.xlane.xlu0 %170 }
 0x18e   :  { %v218_v21 = vpop.xlane.xlu1 %217  ;;  %v233_v31 = vrot.slane %v171_v20, %v232_v25 }
 0x18f   :  { %v265_v41 = vrot.slane %v218_v21, %v237_v26 }
 0x191   :  { %v173_v23 = vpop.xlane.xlu0 %172 }
 0x192   :  { %v175_v24 = vpop.xlane.xlu1 %174  ;;  %v238_v27 = vrot.slane %v173_v23, %v237_v26 }
 0x193   :  { %v244_v32 = vrot.slane %v175_v24, %v232_v25 }
 0x194   :  { %v240_v34 = vsel %vm239_vm0, %v238_v27, %v233_v31 }
 0x195   :  { %v216_v28 = vpop.xlane.xlu0 %215 }
 0x196   :  { %v177_v30 = vpop.xlane.xlu1 %176  ;;  %v261_v35 = vrot.slane %v216_v28, %v232_v25 }
 0x197   :  { %v248_v33 = vrot.slane %v177_v30, %v237_v26 }
 0x198   :  { %v266_v45 = vsel %vm239_vm0, %v265_v41, %v261_v35 }
 0x199   :  { %v249_v36 = vsel %vm239_vm0, %v248_v33, %v244_v32  ;;  %v220_v37 = vpop.xlane.xlu0 %219 }
 0x19a   :  { %v270_v38 = vrot.slane %v220_v37, %v232_v25  ;;  %v222_v39 = vpop.xlane.xlu1 %221  ;;  %v251_v40 = vsel %vm250_vm1, %v249_v36, %v240_v34 }
 0x19b   :  { %v274_v42 = vrot.slane %v222_v39, %v237_v26  ;;  %v669_v43 = vsel %vm223_vm2, %v251_v40, -10000000.0 }
 0x19c   :  { %v282_v44 = vsel %vm279_vm3, %v669_v43, -inf  ;;  %280 = vst.msk [vmem:[#allocation2] sm:$0x3] %vm279_vm3, %v669_v43 }
 0x19d   :  { %v275_v46 = vsel %vm239_vm0, %v274_v42, %v270_v38  ;;  %283 = vmax.xlane.f32.xlu0 %v282_v44 }
 0x19e   :  { %v276_v47 = vsel %vm250_vm1, %v275_v46, %v266_v45 }
 0x19f   :  { %v679_v48 = vsel %vm223_vm2, %v276_v47, -10000000.0 }
 0x1a0   :  { %v296_v49 = vsel %vm279_vm3, %v679_v48, -inf  ;;  %281 = vst.msk [vmem:[#allocation4] sm:$0x3] %vm279_vm3, %v679_v48 }
 0x1a1   :  { %297 = vmax.xlane.f32.xlu1 %v296_v49 }
 0x22a   :  { %v284_v50 = vpop.xlane.xlu0 %283 }
 0x22b   :  { %v285_v51 = vsub.f32 %v669_v43, %v284_v50 }
 0x22d   :  { %v286_v52 = vmul.f32 1.442695, %v285_v51 }
 0x22e   :  { %v298_v53 = vpop.xlane.xlu1 %297 }
 0x22f   :  { %403 = vpow2.f32 %v286_v52  ;;  %v299_v54 = vsub.f32 %v679_v48, %v298_v53 }
 0x231   :  { %v300_v55 = vmul.f32 1.442695, %v299_v54 }
 0x233   :  { %405 = vpow2.f32 %v300_v55 }
 0x239   :  { %v404_v56 = vpop.eup %403 }
 0x23a   :  { %v288_v57 = vsel %vm279_vm3, %v404_v56, 0.0 }
 0x23b   :  { %289 = vadd.xlane.f32.xlu0 %v288_v57 }
 0x23d   :  { %v406_v58 = vpop.eup %405 }
 0x23e   :  { %v302_v59 = vsel %vm279_vm3, %v406_v58, 0.0 }
 0x23f   :  { %303 = vadd.xlane.f32.xlu1 %v302_v59 }
 0x240   :  { %422 = shalt.err (!%p419_p4)
}
 0x241   :  { %s423_s11 = scalar_lea.hbm %s746_s5, 32 }
 0x242   :  { %p424_p5 = scmp.ne.s32.totalorder %s746_s5, %s423_s11  ;;  %p427_p6 = scmp.lt.u32.totalorder %s423_s11, %s746_s5 }
 0x244   :  { %p429_p7 = pnand %p427_p6, %p424_p5 }
 0x246   :  { %432 = shalt.err (!%p429_p7)
}
 0x247   :  { %329 = dma.vmem_to_hbm [thread:$0]  %s327_s28, 32, %s746_s5, [#allocation5]  }
 0x248   :  { %s433_s18 = scalar_lea.vmem %s317_s30, 32  ;;  %p438_p9 = scmp.lt.s32.totalorder %s317_s30, %s317_s30 }
 0x249   :  { %p434_p8 = scmp.ne.s32.totalorder %s317_s30, %s433_s18  ;;  %p439_p10 = scmp.lt.s32.totalorder %s433_s18, %s433_s18 }
 0x24b   :  { %p440_p11 = por %p439_p10, %p438_p9 }
 0x24d   :  { %p441_p12 = pnand %p440_p11, %p434_p8 }
 0x24f   :  { %444 = shalt.err (!%p441_p12)
}
 0x250   :  { %s445_s2 = scalar_lea.hbm %s745_s4, 32 }
 0x251   :  { %p446_p13 = scmp.ne.s32.totalorder %s745_s4, %s445_s2  ;;  %p449_p0 = scmp.lt.u32.totalorder %s445_s2, %s745_s4 }
 0x253   :  { %p451_p1 = pnand %p449_p0, %p446_p13 }
 0x255   :  { %454 = shalt.err (!%p451_p1)
}
 0x256   :  { %319 = dma.vmem_to_hbm [thread:$0]  %s317_s30, 32, %s745_s4, [#allocation3]  }
 0x257   :  { %s509_s25 = smov [#allocation6]   ;;  %s510_s0 = smov [#allocation7]  }
 0x258   :  { %s336_s26 = sshll.u32 %s509_s25, 4  ;;  %s346_s27 = sshll.u32 %s510_s0, 4  ;;  %s337_s26 = int_to_ptr.vmem [resolvable:$true] %s336_s26  ;;  %s347_s27 = int_to_ptr.vmem [resolvable:$true] %s346_s27 }
 0x259   :  { %s455_s4 = scalar_lea.vmem %s337_s26, 32  ;;  %p460_p3 = scmp.lt.s32.totalorder %s337_s26, %s337_s26 }
 0x25a   :  { %p456_p2 = scmp.ne.s32.totalorder %s337_s26, %s455_s4  ;;  %p461_p4 = scmp.lt.s32.totalorder %s455_s4, %s455_s4 }
 0x25c   :  { %p462_p5 = por %p461_p4, %p460_p3 }
 0x25e   :  { %p463_p6 = pnand %p462_p5, %p456_p2 }
 0x2c8   :  { %v290_v60 = vpop.xlane.xlu0 %289 }
 0x2c9   :  { %407 = vlog2.f32 %v290_v60 }
 0x2cc   :  { %v304_v61 = vpop.xlane.xlu1 %303 }
 0x2cd   :  { %409 = vlog2.f32 %v304_v61 }
 0x2d3   :  { %v408_v62 = vpop.eup %407 }
 0x2d4   :  { %v292_v63 = vmul.f32 0.6931472, %v408_v62 }
 0x2d6   :  { %v293_v0 = vadd.f32 %v292_v63, %v284_v50 }
 0x2d7   :  { %v410_v1 = vpop.eup %409 }
 0x2d8   :  { %v306_v2 = vmul.f32 0.6931472, %v410_v1  ;;  %v294_v3 = vsub.f32 %v669_v43, %v293_v0 }
 0x2da   :  { %v307_v4 = vadd.f32 %v306_v2, %v298_v53  ;;  %295 = vst.msk [vmem:[#allocation6] sm:$0x3] %vm279_vm3, %v294_v3 }
 0x2db   :  { %466 = shalt.err (!%p463_p6)
}
 0x2dc   :  { %s467_s29 = scalar_lea.hbm %s747_s6, 32 }
 0x2dd   :  { %p468_p7 = scmp.ne.s32.totalorder %s747_s6, %s467_s29  ;;  %p471_p8 = scmp.lt.u32.totalorder %s467_s29, %s747_s6 }
 0x2df   :  { %p473_p9 = pnand %p471_p8, %p468_p7 }
 0x2e1   :  { %476 = shalt.err (!%p473_p9)
}
 0x2e2   :  { %339 = dma.vmem_to_hbm [thread:$0]  %s337_s26, 32, %s747_s6, [#allocation5]   ;;  %v308_v5 = vsub.f32 %v679_v48, %v307_v4 }
 0x2e3   :  { %s477_s13 = scalar_lea.vmem %s347_s27, 32  ;;  %p482_p11 = scmp.lt.s32.totalorder %s347_s27, %s347_s27 }
 0x2e4   :  { %309 = vst.msk [vmem:[#allocation7] sm:$0x3] %vm279_vm3, %v308_v5  ;;  %p478_p10 = scmp.ne.s32.totalorder %s347_s27, %s477_s13  ;;  %p483_p12 = scmp.lt.s32.totalorder %s477_s13, %s477_s13 }
 0x2e6   :  { %p484_p13 = por %p483_p12, %p482_p11 }
 0x2e8   :  { %p485_p0 = pnand %p484_p13, %p478_p10 }
 0x2ea   :  { %488 = shalt.err (!%p485_p0)
}
 0x2eb   :  { %s489_s16 = scalar_lea.hbm %s748_s7, 32 }
 0x2ec   :  { %p490_p1 = scmp.ne.s32.totalorder %s748_s7, %s489_s16  ;;  %p493_p2 = scmp.lt.u32.totalorder %s489_s16, %s748_s7 }
 0x2ee   :  { %p495_p3 = pnand %p493_p2, %p490_p1 }
 0x2f0   :  { %498 = shalt.err (!%p495_p3)
}
 0x2f1   :  { %349 = dma.vmem_to_hbm [thread:$0]  %s347_s27, 32, %s748_s7, [#allocation8]  }
 0x2f2   :  { %499 = dma.done.wait [#allocation3], 32  }
 0x2f3   :  { %500 = vsyncadd [#allocation3], 4294967264 }
 0x2f4   :  { %501 = dma.done.wait [#allocation5], 64  }
 0x2f5   :  { %502 = vsyncadd [#allocation5], 4294967232 }
 0x2f6   :  { %503 = dma.done.wait [#allocation8], 32  }
 0x2f7   :  { %504 = vsyncadd [#allocation8], 4294967264 }
 0x2f8   :  { %362 = vsyncpa [#allocation3], 1 }
 0x2f9   :  { %363 = vsyncpa [#allocation5], 1 }
 0x2fa   :  { %364 = vsyncpa [#allocation8], 1 }

// kernel: rnn_rc_forward.2
= control target key start
LH: loop header
LB: loop body
LE: loop exit
PB: predicated region body
PF: predicated region fallthrough
CT: control target
= control target key end

     0   :  { %s2816_s9 = smov 0   ;;  %s3231_s0 = inlined_call_operand.vmem [shape: f32[2,2,16,128], index: 0, kind: input, shape index: {}]   ;;  %s3232_s1 = inlined_call_operand.vmem [shape: f32[2,128,128], index: 1, kind: input, shape index: {}]   ;;  %s3233_s2 = inlined_call_operand.vmem [shape: f32[2,2,16,128], index: 2, kind: output, shape index: {}]  }
   0x1 LB: > { %s1559_s10 = sadd.s32 4294967295, %s2796_s9   ;;  %p1563_p0 = scmp.ge.s32.totalorder %s2796_s9, 1  ;;  %s2796_s9 = sphi %s2816_s9, %s12_s9  }
   0x2   : > { %p122_p1 = scmp.lt.s32.totalorder %s2796_s9, 3 }
   0x4   : > { %p123_p2 = pnand %p1563_p0, %p122_p1 }
   0x5   : > { %p149_p3 = scmp.lt.s32.totalorder (!%p123_p2), %s1559_s10, 1  ;;  %v2798_v0 = vmov (!%p123_p2), 0.0|0.0   ;;  %vm2799_vm0 = vmmov (!%p123_p2), 0   ;;  %v2800_v1 = vmov (!%p123_p2), 0.0   ;;  %vm191_vm1 = vcmask (!%p123_p2), 1041409  }
   0x6   : > { %126 = sbr.rel (%p123_p2) target bundleno = 3498 (0xdaa), region = 28  ;;  %2355 = vmatprep.subr.bf16.mxu0 (!%p123_p2), %v2798_v0  ;;  %1862 = vmatprep.mubr.msk.f32.mxu0 (!%p123_p2), %vm2799_vm0, %v2800_v1 }
   0x7   : > { %2379 = vmatprep.subr.bf16.mxu1 (!%p123_p2), %v2798_v0  ;;  %1897 = vmatprep.mubr.msk.f32.mxu1 (!%p123_p2), %vm2799_vm0, %v2800_v1 }
   0xd   : > { %s3235_s10 = smov (!%p149_p3, %s1559_s10), 1 }
   0xe   : > { %s1573_s11 = sshll.u32 %s3235_s10, 7  ;;  %s1572_s12 = sshll.u32 %s3235_s10, 5 }
   0xf   : > { %s2837_s15 = scalar_lea.vmem %s3232_s1, %s1573_s11  ;;  %s2850_s18 = scalar_lea.vmem %s3231_s0, %s1572_s12 }
  0x10   : > { %v164_v2 = vld [vmem:[%s2837_s15] sm:$0xff]  ;;  %v165_v3 = vld [vmem:[%s2837_s15 + $0x8] sm:$0xff]  ;;  %v166_v4 = vld [vmem:[%s2837_s15 + $0x10] sm:$0xff]  ;;  %s2887_s21 = scalar_lea.vmem %s3233_s2, %s1572_s12 }
  0x11   : > { %v2842_v5 = vpack.c.bf16 %v165_v3, %v164_v2  ;;  %v167_v6 = vld [vmem:[%s2837_s15 + $0x18] sm:$0xff]  ;;  %v168_v8 = vld [vmem:[%s2837_s15 + $0x20] sm:$0xff]  ;;  %v169_v9 = vld [vmem:[%s2837_s15 + $0x28] sm:$0xff] }
  0x12   : > { %v2853_v7 = vpack.c.bf16 %v167_v6, %v166_v4  ;;  %v180_v10 = vld [vmem:[%s2850_s18] sm:$0x1]  ;;  %v181_v11 = vld [vmem:[%s2850_s18 + $0x10] sm:$0x1]  ;;  %v2863_v12 = vpack.c.bf16 %v169_v9, %v168_v8  ;;  %v171_v14 = vld [vmem:[%s2837_s15 + $0x38] sm:$0xff] }
  0x13   : > { %2357 = vmatpush3.bf16.msra.mxu0 %v2842_v5  ;;  %2381 = vmatpush3.bf16.msra.mxu1 %v2842_v5  ;;  %2726 = vtanh.f32 %v180_v10  ;;  %v170_v13 = vld [vmem:[%s2837_s15 + $0x30] sm:$0xff]  ;;  %v172_v16 = vld [vmem:[%s2837_s15 + $0x40] sm:$0xff]  ;;  %v173_v17 = vld [vmem:[%s2837_s15 + $0x48] sm:$0xff] }
  0x14   : > { %2358 = vmatprep.subr.bf16.mxu0 %v2798_v0  ;;  %2382 = vmatprep.subr.bf16.mxu1 %v2798_v0  ;;  %2728 = vtanh.f32 %v181_v11  ;;  %v2871_v15 = vpack.c.bf16 %v171_v14, %v170_v13  ;;  %v2879_v18 = vpack.c.bf16 %v173_v17, %v172_v16  ;;  %v174_v20 = vld [vmem:[%s2837_s15 + $0x50] sm:$0xff]  ;;  %v175_v21 = vld [vmem:[%s2837_s15 + $0x58] sm:$0xff]  ;;  %v176_v24 = vld [vmem:[%s2837_s15 + $0x60] sm:$0xff] }
  0x15   : > { %v2896_v23 = vpack.c.bf16 %v175_v21, %v174_v20  ;;  %v177_v25 = vld [vmem:[%s2837_s15 + $0x68] sm:$0xff]  ;;  %v178_v27 = vld [vmem:[%s2837_s15 + $0x70] sm:$0xff]  ;;  %v179_v28 = vld [vmem:[%s2837_s15 + $0x78] sm:$0xff] }
  0x16   : > { %v2904_v26 = vpack.c.bf16 %v177_v25, %v176_v24  ;;  %v2912_v29 = vpack.c.bf16 %v179_v28, %v178_v27  ;;  %v186_v32 = vld [vmem:[%s2850_s18 + $0x1] sm:$0x1]  ;;  %v187_v33 = vld [vmem:[%s2850_s18 + $0x11] sm:$0x1]  ;;  %v274_v43 = vld [vmem:[%s2850_s18 + $0x2] sm:$0x1] }
  0x17   : > { %2360 = vmatpush3.bf16.msra.mxu0 %v2853_v7  ;;  %2384 = vmatpush3.bf16.msra.mxu1 %v2853_v7  ;;  %v275_v44 = vld [vmem:[%s2850_s18 + $0x12] sm:$0x1]  ;;  %v361_v54 = vld [vmem:[%s2850_s18 + $0x3] sm:$0x1]  ;;  %v362_v55 = vld [vmem:[%s2850_s18 + $0x13] sm:$0x1] }
  0x18   : > { %2361 = vmatprep.subr.bf16.mxu0 %v2798_v0  ;;  %2385 = vmatprep.subr.bf16.mxu1 %v2798_v0  ;;  %v448_v3 = vld [vmem:[%s2850_s18 + $0x4] sm:$0x1]  ;;  %v449_v4 = vld [vmem:[%s2850_s18 + $0x14] sm:$0x1]  ;;  %v536_v20 = vld [vmem:[%s2850_s18 + $0x15] sm:$0x1] }
  0x1b   : > { %2363 = vmatpush3.bf16.msra.mxu0 %v2863_v12  ;;  %2387 = vmatpush3.bf16.msra.mxu1 %v2863_v12 }
  0x1c   : > { %2364 = vmatprep.subr.bf16.mxu0 %v2798_v0  ;;  %2388 = vmatprep.subr.bf16.mxu1 %v2798_v0 }
  0x1d   : > { %v2727_v19 = vpop.eup %2726 }
  0x1e   : > { %v2729_v22 = vpop.eup %2728  ;;  %184 = vst [vmem:[%s2887_s21] sm:$0x1] %v2727_v19 }
  0x1f   : > { %2366 = vmatpush3.bf16.msra.mxu0 %v2871_v15  ;;  %2390 = vmatpush3.bf16.msra.mxu1 %v2871_v15  ;;  %185 = vst [vmem:[%s2887_s21 + $0x10] sm:$0x1] %v2729_v22  ;;  %v190_v30 = vrot.slane %v2729_v22, 7 }
  0x20   : > { %2367 = vmatprep.subr.bf16.mxu0 %v2798_v0  ;;  %2391 = vmatprep.subr.bf16.mxu1 %v2798_v0 }
  0x21   : > { %v192_v31 = vsel %vm191_vm1, %v190_v30, %v2727_v19  ;;  %v535_v19 = vld [vmem:[%s2850_s18 + $0x5] sm:$0x1] }
  0x23   : > { %2369 = vmatpush3.bf16.msra.mxu0 %v2879_v18  ;;  %2393 = vmatpush3.bf16.msra.mxu1 %v2879_v18 }
  0x24   : > { %2370 = vmatprep.subr.bf16.mxu0 %v2798_v0  ;;  %2394 = vmatprep.subr.bf16.mxu1 %v2798_v0 }
  0x27   : > { %2372 = vmatpush3.bf16.msra.mxu0 %v2896_v23  ;;  %2396 = vmatpush3.bf16.msra.mxu1 %v2896_v23 }
  0x28   : > { %2373 = vmatprep.subr.bf16.mxu0 %v2798_v0  ;;  %2397 = vmatprep.subr.bf16.mxu1 %v2798_v0 }
  0x2b   : > { %2375 = vmatpush3.bf16.msra.mxu0 %v2904_v26  ;;  %2399 = vmatpush3.bf16.msra.mxu1 %v2904_v26 }
  0x2c   : > { %2376 = vmatprep.subr.bf16.mxu0 %v2798_v0  ;;  %2400 = vmatprep.subr.bf16.mxu1 %v2798_v0 }
  0x2f   : > { %2378 = vmatpush3.bf16.msra.mxu0 %v2912_v29  ;;  %2402 = vmatpush3.bf16.msra.mxu1 %v2912_v29 }
  0x30   : > { %2403 = vmatprep.subr.bf16.mxu0 %v2798_v0  ;;  %2427 = vmatprep.subr.bf16.mxu1 %v2798_v0 }
  0x32   : > { %1863 = vmatmul.mubr.f32.vlgmr.msra.gmra.mrb[0].mxu0 %v192_v31 }
  0x33   : > { %2405 = vmatpush3.bf16.msra.mxu0 %v2842_v5  ;;  %1932 = vmatprep.mubr.msk.f32.mxu0 %vm2799_vm0, %v2800_v1 }
  0x34   : > { %2406 = vmatprep.subr.bf16.mxu0 %v2798_v0 }
  0x37   : > { %2408 = vmatpush3.bf16.msra.mxu0 %v2853_v7 }
  0x38   : > { %2409 = vmatprep.subr.bf16.mxu0 %v2798_v0 }
  0x3b   : > { %2411 = vmatpush3.bf16.msra.mxu0 %v2863_v12 }
  0x3c   : > { %2412 = vmatprep.subr.bf16.mxu0 %v2798_v0 }
  0x3f   : > { %2414 = vmatpush3.bf16.msra.mxu0 %v2871_v15 }
  0x40   : > { %2415 = vmatprep.subr.bf16.mxu0 %v2798_v0 }
  0x43   : > { %2417 = vmatpush3.bf16.msra.mxu0 %v2879_v18 }
  0x44   : > { %2418 = vmatprep.subr.bf16.mxu0 %v2798_v0 }
  0x47   : > { %2420 = vmatpush3.bf16.msra.mxu0 %v2896_v23 }
  0x48   : > { %2421 = vmatprep.subr.bf16.mxu0 %v2798_v0 }
  0x4b   : > { %2423 = vmatpush3.bf16.msra.mxu0 %v2904_v26 }
  0x4c   : > { %2424 = vmatprep.subr.bf16.mxu0 %v2798_v0 }
  0x4f   : > { %2426 = vmatpush3.bf16.msra.mxu0 %v2912_v29 }
  0x50   : > { %2451 = vmatprep.subr.bf16.mxu0 %v2798_v0 }
 0x105   : > { %v260_v34 = vpop.f32.mrb[0].mxu0 }
 0x106   : > { %v265_v35 = vrot.slane %v260_v34, 1  ;;  %v268_v36 = vadd.f32 %v260_v34, %v186_v32  ;;  %v1864_v37 = vpop.f32.mrb[1].mxu0  ;;  %v623_v34 = vld [vmem:[%s2850_s18 + $0x16] sm:$0x1] }
 0x108   : > { %v269_v38 = vadd.f32 %v265_v35, %v187_v33  ;;  %2730 = vtanh.f32 %v268_v36  ;;  %v622_v33 = vld [vmem:[%s2850_s18 + $0x6] sm:$0x1] }
 0x10a   : > { %2732 = vtanh.f32 %v269_v38 }
 0x112   : > { %v2731_v39 = vpop.eup %2730 }
 0x113   : > { %272 = vst [vmem:[%s2887_s21 + $0x1] sm:$0x1] %v2731_v39 }
 0x114   : > { %v2733_v40 = vpop.eup %2732 }
 0x115   : > { %273 = vst [vmem:[%s2887_s21 + $0x11] sm:$0x1] %v2733_v40  ;;  %v278_v41 = vrot.slane %v2733_v40, 7 }
 0x117   : > { %v279_v42 = vsel %vm191_vm1, %v278_v41, %v2731_v39 }
 0x118   : > { %1898 = vmatmul.mubr.f32.vlgmr.msra.gmra.mrb[0].mxu1 %v279_v42 }
 0x119   : > { %2429 = vmatpush3.bf16.msra.mxu1 %v2842_v5  ;;  %1967 = vmatprep.mubr.msk.f32.mxu1 %vm2799_vm0, %v2800_v1 }
 0x11a   : > { %2430 = vmatprep.subr.bf16.mxu1 %v2798_v0 }
 0x11d   : > { %2432 = vmatpush3.bf16.msra.mxu1 %v2853_v7 }
 0x11e   : > { %2433 = vmatprep.subr.bf16.mxu1 %v2798_v0 }
 0x121   : > { %2435 = vmatpush3.bf16.msra.mxu1 %v2863_v12 }
 0x122   : > { %2436 = vmatprep.subr.bf16.mxu1 %v2798_v0 }
 0x125   : > { %2438 = vmatpush3.bf16.msra.mxu1 %v2871_v15 }
 0x126   : > { %2439 = vmatprep.subr.bf16.mxu1 %v2798_v0 }
 0x129   : > { %2441 = vmatpush3.bf16.msra.mxu1 %v2879_v18 }
 0x12a   : > { %2442 = vmatprep.subr.bf16.mxu1 %v2798_v0 }
 0x12d   : > { %2444 = vmatpush3.bf16.msra.mxu1 %v2896_v23 }
 0x12e   : > { %2445 = vmatprep.subr.bf16.mxu1 %v2798_v0 }
 0x131   : > { %2447 = vmatpush3.bf16.msra.mxu1 %v2904_v26 }
 0x132   : > { %2448 = vmatprep.subr.bf16.mxu1 %v2798_v0 }
 0x135   : > { %2450 = vmatpush3.bf16.msra.mxu1 %v2912_v29 }
 0x136   : > { %2475 = vmatprep.subr.bf16.mxu1 %v2798_v0 }
 0x1eb   : > { %v347_v45 = vpop.f32.mrb[0].mxu1 }
 0x1ec   : > { %v352_v46 = vrot.slane %v347_v45, 1  ;;  %v355_v47 = vadd.f32 %v347_v45, %v274_v43  ;;  %v1899_v48 = vpop.f32.mrb[1].mxu1  ;;  %v710_v45 = vld [vmem:[%s2850_s18 + $0x17] sm:$0x1] }
 0x1ee   : > { %v356_v49 = vadd.f32 %v352_v46, %v275_v44  ;;  %2734 = vtanh.f32 %v355_v47  ;;  %v709_v44 = vld [vmem:[%s2850_s18 + $0x7] sm:$0x1] }
 0x1f0   : > { %2736 = vtanh.f32 %v356_v49 }
 0x1f8   : > { %v2735_v50 = vpop.eup %2734 }
 0x1f9   : > { %359 = vst [vmem:[%s2887_s21 + $0x2] sm:$0x1] %v2735_v50 }
 0x1fa   : > { %v2737_v51 = vpop.eup %2736 }
 0x1fb   : > { %360 = vst [vmem:[%s2887_s21 + $0x12] sm:$0x1] %v2737_v51  ;;  %v365_v52 = vrot.slane %v2737_v51, 7 }
 0x1fd   : > { %v366_v53 = vsel %vm191_vm1, %v365_v52, %v2735_v50 }
 0x1fe   : > { %1933 = vmatmul.mubr.f32.vlgmr.msra.gmra.mrb[2].mxu0 %v366_v53 }
 0x1ff   : > { %2453 = vmatpush3.bf16.msra.mxu0 %v2842_v5  ;;  %2002 = vmatprep.mubr.msk.f32.mxu0 %vm2799_vm0, %v2800_v1 }
 0x200   : > { %2454 = vmatprep.subr.bf16.mxu0 %v2798_v0 }
 0x203   : > { %2456 = vmatpush3.bf16.msra.mxu0 %v2853_v7 }
 0x204   : > { %2457 = vmatprep.subr.bf16.mxu0 %v2798_v0 }
 0x207   : > { %2459 = vmatpush3.bf16.msra.mxu0 %v2863_v12 }
 0x208   : > { %2460 = vmatprep.subr.bf16.mxu0 %v2798_v0 }
 0x20b   : > { %2462 = vmatpush3.bf16.msra.mxu0 %v2871_v15 }
 0x20c   : > { %2463 = vmatprep.subr.bf16.mxu0 %v2798_v0 }
 0x20f   : > { %2465 = vmatpush3.bf16.msra.mxu0 %v2879_v18 }
 0x210   : > { %2466 = vmatprep.subr.bf16.mxu0 %v2798_v0 }
 0x213   : > { %2468 = vmatpush3.bf16.msra.mxu0 %v2896_v23 }
 0x214   : > { %2469 = vmatprep.subr.bf16.mxu0 %v2798_v0 }
 0x217   : > { %2471 = vmatpush3.bf16.msra.mxu0 %v2904_v26 }
 0x218   : > { %2472 = vmatprep.subr.bf16.mxu0 %v2798_v0 }
 0x21b   : > { %2474 = vmatpush3.bf16.msra.mxu0 %v2912_v29 }
 0x21c   : > { %2499 = vmatprep.subr.bf16.mxu0 %v2798_v0 }
 0x2d1   : > { %v434_v56 = vpop.f32.mrb[2].mxu0 }
 0x2d2   : > { %v439_v57 = vrot.slane %v434_v56, 1  ;;  %v442_v58 = vadd.f32 %v434_v56, %v361_v54  ;;  %v1934_v59 = vpop.f32.mrb[3].mxu0  ;;  %v797_v56 = vld [vmem:[%s2850_s18 + $0x18] sm:$0x1] }
 0x2d4   : > { %v443_v60 = vadd.f32 %v439_v57, %v362_v55  ;;  %2738 = vtanh.f32 %v442_v58  ;;  %v796_v55 = vld [vmem:[%s2850_s18 + $0x8] sm:$0x1] }
 0x2d6   : > { %2740 = vtanh.f32 %v443_v60 }
 0x2de   : > { %v2739_v61 = vpop.eup %2738 }
 0x2df   : > { %446 = vst [vmem:[%s2887_s21 + $0x3] sm:$0x1] %v2739_v61 }
 0x2e0   : > { %v2741_v62 = vpop.eup %2740 }
 0x2e1   : > { %447 = vst [vmem:[%s2887_s21 + $0x13] sm:$0x1] %v2741_v62  ;;  %v452_v63 = vrot.slane %v2741_v62, 7 }
 0x2e3   : > { %v453_v2 = vsel %vm191_vm1, %v452_v63, %v2739_v61 }
 0x2e4   : > { %1968 = vmatmul.mubr.f32.vlgmr.msra.gmra.mrb[2].mxu1 %v453_v2 }
 0x2e5   : > { %2477 = vmatpush3.bf16.msra.mxu1 %v2842_v5  ;;  %2037 = vmatprep.mubr.msk.f32.mxu1 %vm2799_vm0, %v2800_v1 }
 0x2e6   : > { %2478 = vmatprep.subr.bf16.mxu1 %v2798_v0 }
 0x2e9   : > { %2480 = vmatpush3.bf16.msra.mxu1 %v2853_v7 }
 0x2ea   : > { %2481 = vmatprep.subr.bf16.mxu1 %v2798_v0 }
 0x2ed   : > { %2483 = vmatpush3.bf16.msra.mxu1 %v2863_v12 }
 0x2ee   : > { %2484 = vmatprep.subr.bf16.mxu1 %v2798_v0 }
 0x2f1   : > { %2486 = vmatpush3.bf16.msra.mxu1 %v2871_v15 }
 0x2f2   : > { %2487 = vmatprep.subr.bf16.mxu1 %v2798_v0 }
 0x2f5   : > { %2489 = vmatpush3.bf16.msra.mxu1 %v2879_v18 }
 0x2f6   : > { %2490 = vmatprep.subr.bf16.mxu1 %v2798_v0 }
 0x2f9   : > { %2492 = vmatpush3.bf16.msra.mxu1 %v2896_v23 }
 0x2fa   : > { %2493 = vmatprep.subr.bf16.mxu1 %v2798_v0 }
 0x2fd   : > { %2495 = vmatpush3.bf16.msra.mxu1 %v2904_v26 }
 0x2fe   : > { %2496 = vmatprep.subr.bf16.mxu1 %v2798_v0 }
 0x301   : > { %2498 = vmatpush3.bf16.msra.mxu1 %v2912_v29 }
 0x302   : > { %2523 = vmatprep.subr.bf16.mxu1 %v2798_v0 }
 0x3b7   : > { %v521_v6 = vpop.f32.mrb[2].mxu1 }
 0x3b8   : > { %v526_v8 = vrot.slane %v521_v6, 1  ;;  %v529_v9 = vadd.f32 %v521_v6, %v448_v3  ;;  %v1969_v10 = vpop.f32.mrb[3].mxu1  ;;  %v884_v6 = vld [vmem:[%s2850_s18 + $0x19] sm:$0x1] }
 0x3ba   : > { %v530_v11 = vadd.f32 %v526_v8, %v449_v4  ;;  %2742 = vtanh.f32 %v529_v9  ;;  %v883_v4 = vld [vmem:[%s2850_s18 + $0x9] sm:$0x1] }
 0x3bc   : > { %2744 = vtanh.f32 %v530_v11 }
 0x3c4   : > { %v2743_v13 = vpop.eup %2742 }
 0x3c5   : > { %533 = vst [vmem:[%s2887_s21 + $0x4] sm:$0x1] %v2743_v13 }
 0x3c6   : > { %v2745_v14 = vpop.eup %2744 }
 0x3c7   : > { %534 = vst [vmem:[%s2887_s21 + $0x14] sm:$0x1] %v2745_v14  ;;  %v539_v16 = vrot.slane %v2745_v14, 7 }
 0x3c9   : > { %v540_v17 = vsel %vm191_vm1, %v539_v16, %v2743_v13 }
 0x3ca   : > { %2003 = vmatmul.mubr.f32.vlgmr.msra.gmra.mrb[4].mxu0 %v540_v17 }
 0x3cb   : > { %2501 = vmatpush3.bf16.msra.mxu0 %v2842_v5  ;;  %2072 = vmatprep.mubr.msk.f32.mxu0 %vm2799_vm0, %v2800_v1 }
 0x3cc   : > { %2502 = vmatprep.subr.bf16.mxu0 %v2798_v0 }
 0x3cf   : > { %2504 = vmatpush3.bf16.msra.mxu0 %v2853_v7 }
 0x3d0   : > { %2505 = vmatprep.subr.bf16.mxu0 %v2798_v0 }
 0x3d3   : > { %2507 = vmatpush3.bf16.msra.mxu0 %v2863_v12 }
 0x3d4   : > { %2508 = vmatprep.subr.bf16.mxu0 %v2798_v0 }
 0x3d7   : > { %2510 = vmatpush3.bf16.msra.mxu0 %v2871_v15 }
 0x3d8   : > { %2511 = vmatprep.subr.bf16.mxu0 %v2798_v0 }
 0x3db   : > { %2513 = vmatpush3.bf16.msra.mxu0 %v2879_v18 }
 0x3dc   : > { %2514 = vmatprep.subr.bf16.mxu0 %v2798_v0 }
 0x3df   : > { %2516 = vmatpush3.bf16.msra.mxu0 %v2896_v23 }
 0x3e0   : > { %2517 = vmatprep.subr.bf16.mxu0 %v2798_v0 }
 0x3e3   : > { %2519 = vmatpush3.bf16.msra.mxu0 %v2904_v26 }
 0x3e4   : > { %2520 = vmatprep.subr.bf16.mxu0 %v2798_v0 }
 0x3e7   : > { %2522 = vmatpush3.bf16.msra.mxu0 %v2912_v29 }
 0x3e8   : > { %2547 = vmatprep.subr.bf16.mxu0 %v2798_v0 }
 0x49d   : > { %v608_v21 = vpop.f32.mrb[4].mxu0 }
 0x49e   : > { %v613_v22 = vrot.slane %v608_v21, 1  ;;  %v616_v24 = vadd.f32 %v608_v21, %v535_v19  ;;  %v2004_v25 = vpop.f32.mrb[5].mxu0  ;;  %v971_v21 = vld [vmem:[%s2850_s18 + $0x1a] sm:$0x1] }
 0x4a0   : > { %v617_v27 = vadd.f32 %v613_v22, %v536_v20  ;;  %2746 = vtanh.f32 %v616_v24  ;;  %v970_v20 = vld [vmem:[%s2850_s18 + $0xa] sm:$0x1] }
 0x4a2   : > { %2748 = vtanh.f32 %v617_v27 }
 0x4aa   : > { %v2747_v28 = vpop.eup %2746 }
 0x4ab   : > { %620 = vst [vmem:[%s2887_s21 + $0x5] sm:$0x1] %v2747_v28 }
 0x4ac   : > { %v2749_v30 = vpop.eup %2748 }
 0x4ad   : > { %621 = vst [vmem:[%s2887_s21 + $0x15] sm:$0x1] %v2749_v30  ;;  %v626_v31 = vrot.slane %v2749_v30, 7 }
 0x4af   : > { %v627_v32 = vsel %vm191_vm1, %v626_v31, %v2747_v28 }
 0x4b0   : > { %2038 = vmatmul.mubr.f32.vlgmr.msra.gmra.mrb[4].mxu1 %v627_v32 }
 0x4b1   : > { %2525 = vmatpush3.bf16.msra.mxu1 %v2842_v5  ;;  %2107 = vmatprep.mubr.msk.f32.mxu1 %vm2799_vm0, %v2800_v1 }
 0x4b2   : > { %2526 = vmatprep.subr.bf16.mxu1 %v2798_v0 }
 0x4b5   : > { %2528 = vmatpush3.bf16.msra.mxu1 %v2853_v7 }
 0x4b6   : > { %2529 = vmatprep.subr.bf16.mxu1 %v2798_v0 }
 0x4b9   : > { %2531 = vmatpush3.bf16.msra.mxu1 %v2863_v12 }
 0x4ba   : > { %2532 = vmatprep.subr.bf16.mxu1 %v2798_v0 }
 0x4bd   : > { %2534 = vmatpush3.bf16.msra.mxu1 %v2871_v15 }
 0x4be   : > { %2535 = vmatprep.subr.bf16.mxu1 %v2798_v0 }
 0x4c1   : > { %2537 = vmatpush3.bf16.msra.mxu1 %v2879_v18 }
 0x4c2   : > { %2538 = vmatprep.subr.bf16.mxu1 %v2798_v0 }
 0x4c5   : > { %2540 = vmatpush3.bf16.msra.mxu1 %v2896_v23 }
 0x4c6   : > { %2541 = vmatprep.subr.bf16.mxu1 %v2798_v0 }
 0x4c9   : > { %2543 = vmatpush3.bf16.msra.mxu1 %v2904_v26 }
 0x4ca   : > { %2544 = vmatprep.subr.bf16.mxu1 %v2798_v0 }
 0x4cd   : > { %2546 = vmatpush3.bf16.msra.mxu1 %v2912_v29 }
 0x4ce   : > { %2571 = vmatprep.subr.bf16.mxu1 %v2798_v0 }
 0x583   : > { %v695_v35 = vpop.f32.mrb[4].mxu1 }
 0x584   : > { %v700_v36 = vrot.slane %v695_v35, 1  ;;  %v703_v37 = vadd.f32 %v695_v35, %v622_v33  ;;  %v2039_v38 = vpop.f32.mrb[5].mxu1  ;;  %v1058_v35 = vld [vmem:[%s2850_s18 + $0x1b] sm:$0x1] }
 0x586   : > { %v704_v39 = vadd.f32 %v700_v36, %v623_v34  ;;  %2750 = vtanh.f32 %v703_v37  ;;  %v1057_v34 = vld [vmem:[%s2850_s18 + $0xb] sm:$0x1] }
 0x588   : > { %2752 = vtanh.f32 %v704_v39 }
 0x590   : > { %v2751_v40 = vpop.eup %2750 }
 0x591   : > { %707 = vst [vmem:[%s2887_s21 + $0x6] sm:$0x1] %v2751_v40 }
 0x592   : > { %v2753_v41 = vpop.eup %2752 }
 0x593   : > { %708 = vst [vmem:[%s2887_s21 + $0x16] sm:$0x1] %v2753_v41  ;;  %v713_v42 = vrot.slane %v2753_v41, 7 }
 0x595   : > { %v714_v43 = vsel %vm191_vm1, %v713_v42, %v2751_v40 }
 0x596   : > { %2073 = vmatmul.mubr.f32.vlgmr.msra.gmra.mrb[6].mxu0 %v714_v43 }
 0x597   : > { %2549 = vmatpush3.bf16.msra.mxu0 %v2842_v5  ;;  %2142 = vmatprep.mubr.msk.f32.mxu0 %vm2799_vm0, %v2800_v1 }
 0x598   : > { %2550 = vmatprep.subr.bf16.mxu0 %v2798_v0 }
 0x59b   : > { %2552 = vmatpush3.bf16.msra.mxu0 %v2853_v7 }
 0x59c   : > { %2553 = vmatprep.subr.bf16.mxu0 %v2798_v0 }
 0x59f   : > { %2555 = vmatpush3.bf16.msra.mxu0 %v2863_v12 }
 0x5a0   : > { %2556 = vmatprep.subr.bf16.mxu0 %v2798_v0 }
 0x5a3   : > { %2558 = vmatpush3.bf16.msra.mxu0 %v2871_v15 }
 0x5a4   : > { %2559 = vmatprep.subr.bf16.mxu0 %v2798_v0 }
 0x5a7   : > { %2561 = vmatpush3.bf16.msra.mxu0 %v2879_v18 }
 0x5a8   : > { %2562 = vmatprep.subr.bf16.mxu0 %v2798_v0 }
 0x5ab   : > { %2564 = vmatpush3.bf16.msra.mxu0 %v2896_v23 }
 0x5ac   : > { %2565 = vmatprep.subr.bf16.mxu0 %v2798_v0 }
 0x5af   : > { %2567 = vmatpush3.bf16.msra.mxu0 %v2904_v26 }
 0x5b0   : > { %2568 = vmatprep.subr.bf16.mxu0 %v2798_v0 }
 0x5b3   : > { %2570 = vmatpush3.bf16.msra.mxu0 %v2912_v29 }
 0x5b4   : > { %2595 = vmatprep.subr.bf16.mxu0 %v2798_v0 }
 0x669   : > { %v782_v46 = vpop.f32.mrb[6].mxu0 }
 0x66a   : > { %v787_v47 = vrot.slane %v782_v46, 1  ;;  %v790_v48 = vadd.f32 %v782_v46, %v709_v44  ;;  %v2074_v49 = vpop.f32.mrb[7].mxu0  ;;  %v1145_v46 = vld [vmem:[%s2850_s18 + $0x1c] sm:$0x1] }
 0x66c   : > { %v791_v50 = vadd.f32 %v787_v47, %v710_v45  ;;  %2754 = vtanh.f32 %v790_v48  ;;  %v1144_v45 = vld [vmem:[%s2850_s18 + $0xc] sm:$0x1] }
 0x66e   : > { %2756 = vtanh.f32 %v791_v50 }
 0x676   : > { %v2755_v51 = vpop.eup %2754 }
 0x677   : > { %794 = vst [vmem:[%s2887_s21 + $0x7] sm:$0x1] %v2755_v51 }
 0x678   : > { %v2757_v52 = vpop.eup %2756 }
 0x679   : > { %795 = vst [vmem:[%s2887_s21 + $0x17] sm:$0x1] %v2757_v52  ;;  %v800_v53 = vrot.slane %v2757_v52, 7 }
 0x67b   : > { %v801_v54 = vsel %vm191_vm1, %v800_v53, %v2755_v51 }
 0x67c   : > { %2108 = vmatmul.mubr.f32.vlgmr.msra.gmra.mrb[6].mxu1 %v801_v54 }
 0x67d   : > { %2573 = vmatpush3.bf16.msra.mxu1 %v2842_v5  ;;  %2177 = vmatprep.mubr.msk.f32.mxu1 %vm2799_vm0, %v2800_v1 }
 0x67e   : > { %2574 = vmatprep.subr.bf16.mxu1 %v2798_v0 }
 0x681   : > { %2576 = vmatpush3.bf16.msra.mxu1 %v2853_v7 }
 0x682   : > { %2577 = vmatprep.subr.bf16.mxu1 %v2798_v0 }
 0x685   : > { %2579 = vmatpush3.bf16.msra.mxu1 %v2863_v12 }
 0x686   : > { %2580 = vmatprep.subr.bf16.mxu1 %v2798_v0 }
 0x689   : > { %2582 = vmatpush3.bf16.msra.mxu1 %v2871_v15 }
 0x68a   : > { %2583 = vmatprep.subr.bf16.mxu1 %v2798_v0 }
 0x68d   : > { %2585 = vmatpush3.bf16.msra.mxu1 %v2879_v18 }
 0x68e   : > { %2586 = vmatprep.subr.bf16.mxu1 %v2798_v0 }
 0x691   : > { %2588 = vmatpush3.bf16.msra.mxu1 %v2896_v23 }
 0x692   : > { %2589 = vmatprep.subr.bf16.mxu1 %v2798_v0 }
 0x695   : > { %2591 = vmatpush3.bf16.msra.mxu1 %v2904_v26 }
 0x696   : > { %2592 = vmatprep.subr.bf16.mxu1 %v2798_v0 }
 0x699   : > { %2594 = vmatpush3.bf16.msra.mxu1 %v2912_v29 }
 0x69a   : > { %2619 = vmatprep.subr.bf16.mxu1 %v2798_v0 }
 0x74f   : > { %v869_v57 = vpop.f32.mrb[6].mxu1 }
 0x750   : > { %v874_v58 = vrot.slane %v869_v57, 1  ;;  %v877_v59 = vadd.f32 %v869_v57, %v796_v55  ;;  %v2109_v60 = vpop.f32.mrb[7].mxu1 }
 0x752   : > { %v878_v61 = vadd.f32 %v874_v58, %v797_v56  ;;  %2758 = vtanh.f32 %v877_v59  ;;  %v1319_v58 = vld [vmem:[%s2850_s18 + $0x1e] sm:$0x1] }
 0x754   : > { %2760 = vtanh.f32 %v878_v61 }
 0x75c   : > { %v2759_v62 = vpop.eup %2758 }
 0x75d   : > { %881 = vst [vmem:[%s2887_s21 + $0x8] sm:$0x1] %v2759_v62 }
 0x75e   : > { %v2761_v63 = vpop.eup %2760 }
 0x75f   : > { %882 = vst [vmem:[%s2887_s21 + $0x18] sm:$0x1] %v2761_v63  ;;  %v887_v2 = vrot.slane %v2761_v63, 7 }
 0x761   : > { %v888_v3 = vsel %vm191_vm1, %v887_v2, %v2759_v62 }
 0x762   : > { %2143 = vmatmul.mubr.f32.vlgmr.msra.gmra.mrb[8].mxu0 %v888_v3 }
 0x763   : > { %2597 = vmatpush3.bf16.msra.mxu0 %v2842_v5  ;;  %2212 = vmatprep.mubr.msk.f32.mxu0 %vm2799_vm0, %v2800_v1 }
 0x764   : > { %2598 = vmatprep.subr.bf16.mxu0 %v2798_v0 }
 0x767   : > { %2600 = vmatpush3.bf16.msra.mxu0 %v2853_v7 }
 0x768   : > { %2601 = vmatprep.subr.bf16.mxu0 %v2798_v0 }
 0x76b   : > { %2603 = vmatpush3.bf16.msra.mxu0 %v2863_v12 }
 0x76c   : > { %2604 = vmatprep.subr.bf16.mxu0 %v2798_v0 }
 0x76f   : > { %2606 = vmatpush3.bf16.msra.mxu0 %v2871_v15 }
 0x770   : > { %2607 = vmatprep.subr.bf16.mxu0 %v2798_v0 }
 0x773   : > { %2609 = vmatpush3.bf16.msra.mxu0 %v2879_v18 }
 0x774   : > { %2610 = vmatprep.subr.bf16.mxu0 %v2798_v0 }
 0x777   : > { %2612 = vmatpush3.bf16.msra.mxu0 %v2896_v23 }
 0x778   : > { %2613 = vmatprep.subr.bf16.mxu0 %v2798_v0 }
 0x77b   : > { %2615 = vmatpush3.bf16.msra.mxu0 %v2904_v26 }
 0x77c   : > { %2616 = vmatprep.subr.bf16.mxu0 %v2798_v0 }
 0x77f   : > { %2618 = vmatpush3.bf16.msra.mxu0 %v2912_v29 }
 0x780   : > { %2643 = vmatprep.subr.bf16.mxu0 %v2798_v0 }
 0x835   : > { %v956_v8 = vpop.f32.mrb[8].mxu0 }
 0x836   : > { %v961_v9 = vrot.slane %v956_v8, 1  ;;  %v964_v10 = vadd.f32 %v956_v8, %v883_v4  ;;  %v2144_v11 = vpop.f32.mrb[9].mxu0  ;;  %v1405_v8 = vld [vmem:[%s2850_s18 + $0xf] sm:$0x1] }
 0x838   : > { %v965_v13 = vadd.f32 %v961_v9, %v884_v6  ;;  %2762 = vtanh.f32 %v964_v10  ;;  %v1406_v9 = vld [vmem:[%s2850_s18 + $0x1f] sm:$0x1] }
 0x83a   : > { %2764 = vtanh.f32 %v965_v13 }
 0x842   : > { %v2763_v14 = vpop.eup %2762 }
 0x843   : > { %968 = vst [vmem:[%s2887_s21 + $0x9] sm:$0x1] %v2763_v14 }
 0x844   : > { %v2765_v16 = vpop.eup %2764 }
 0x845   : > { %969 = vst [vmem:[%s2887_s21 + $0x19] sm:$0x1] %v2765_v16  ;;  %v974_v17 = vrot.slane %v2765_v16, 7 }
 0x847   : > { %v975_v19 = vsel %vm191_vm1, %v974_v17, %v2763_v14 }
 0x848   : > { %2178 = vmatmul.mubr.f32.vlgmr.msra.gmra.mrb[8].mxu1 %v975_v19 }
 0x849   : > { %2621 = vmatpush3.bf16.msra.mxu1 %v2842_v5  ;;  %2247 = vmatprep.mubr.msk.f32.mxu1 %vm2799_vm0, %v2800_v1 }
 0x84a   : > { %2622 = vmatprep.subr.bf16.mxu1 %v2798_v0 }
 0x84d   : > { %2624 = vmatpush3.bf16.msra.mxu1 %v2853_v7 }
 0x84e   : > { %2625 = vmatprep.subr.bf16.mxu1 %v2798_v0 }
 0x851   : > { %2627 = vmatpush3.bf16.msra.mxu1 %v2863_v12 }
 0x852   : > { %2628 = vmatprep.subr.bf16.mxu1 %v2798_v0 }
 0x855   : > { %2630 = vmatpush3.bf16.msra.mxu1 %v2871_v15 }
 0x856   : > { %2631 = vmatprep.subr.bf16.mxu1 %v2798_v0 }
 0x859   : > { %2633 = vmatpush3.bf16.msra.mxu1 %v2879_v18 }
 0x85a   : > { %2634 = vmatprep.subr.bf16.mxu1 %v2798_v0 }
 0x85d   : > { %2636 = vmatpush3.bf16.msra.mxu1 %v2896_v23 }
 0x85e   : > { %2637 = vmatprep.subr.bf16.mxu1 %v2798_v0 }
 0x861   : > { %2639 = vmatpush3.bf16.msra.mxu1 %v2904_v26 }
 0x862   : > { %2640 = vmatprep.subr.bf16.mxu1 %v2798_v0 }
 0x865   : > { %2642 = vmatpush3.bf16.msra.mxu1 %v2912_v29 }
 0x866   : > { %2667 = vmatprep.subr.bf16.mxu1 %v2798_v0 }
 0x91b   : > { %v1043_v22 = vpop.f32.mrb[8].mxu1 }
 0x91c   : > { %v1048_v24 = vrot.slane %v1043_v22, 1  ;;  %v1051_v25 = vadd.f32 %v1043_v22, %v970_v20  ;;  %v2179_v27 = vpop.f32.mrb[9].mxu1 }
 0x91e   : > { %v1052_v28 = vadd.f32 %v1048_v24, %v971_v21  ;;  %2766 = vtanh.f32 %v1051_v25 }
 0x920   : > { %2768 = vtanh.f32 %v1052_v28 }
 0x928   : > { %v2767_v30 = vpop.eup %2766 }
 0x929   : > { %1055 = vst [vmem:[%s2887_s21 + $0xa] sm:$0x1] %v2767_v30 }
 0x92a   : > { %v2769_v31 = vpop.eup %2768 }
 0x92b   : > { %1056 = vst [vmem:[%s2887_s21 + $0x1a] sm:$0x1] %v2769_v31  ;;  %v1061_v32 = vrot.slane %v2769_v31, 7 }
 0x92d   : > { %v1062_v33 = vsel %vm191_vm1, %v1061_v32, %v2767_v30 }
 0x92e   : > { %2213 = vmatmul.mubr.f32.vlgmr.msra.gmra.mrb[10].mxu0 %v1062_v33 }
 0x92f   : > { %2645 = vmatpush3.bf16.msra.mxu0 %v2842_v5  ;;  %2282 = vmatprep.mubr.msk.f32.mxu0 %vm2799_vm0, %v2800_v1 }
 0x930   : > { %2646 = vmatprep.subr.bf16.mxu0 %v2798_v0 }
 0x933   : > { %2648 = vmatpush3.bf16.msra.mxu0 %v2853_v7 }
 0x934   : > { %2649 = vmatprep.subr.bf16.mxu0 %v2798_v0 }
 0x937   : > { %2651 = vmatpush3.bf16.msra.mxu0 %v2863_v12 }
 0x938   : > { %2652 = vmatprep.subr.bf16.mxu0 %v2798_v0 }
 0x93b   : > { %2654 = vmatpush3.bf16.msra.mxu0 %v2871_v15 }
 0x93c   : > { %2655 = vmatprep.subr.bf16.mxu0 %v2798_v0 }
 0x93f   : > { %2657 = vmatpush3.bf16.msra.mxu0 %v2879_v18 }
 0x940   : > { %2658 = vmatprep.subr.bf16.mxu0 %v2798_v0 }
 0x943   : > { %2660 = vmatpush3.bf16.msra.mxu0 %v2896_v23 }
 0x944   : > { %2661 = vmatprep.subr.bf16.mxu0 %v2798_v0 }
 0x947   : > { %2663 = vmatpush3.bf16.msra.mxu0 %v2904_v26 }
 0x948   : > { %2664 = vmatprep.subr.bf16.mxu0 %v2798_v0 }
 0x94b   : > { %2666 = vmatpush3.bf16.msra.mxu0 %v2912_v29 }
 0x94c   : > { %2691 = vmatprep.subr.bf16.mxu0 %v2798_v0 }
 0xa01   : > { %v1130_v36 = vpop.f32.mrb[10].mxu0 }
 0xa02   : > { %v1135_v37 = vrot.slane %v1130_v36, 1  ;;  %v1138_v38 = vadd.f32 %v1130_v36, %v1057_v34  ;;  %v2214_v39 = vpop.f32.mrb[11].mxu0 }
 0xa04   : > { %v1139_v40 = vadd.f32 %v1135_v37, %v1058_v35  ;;  %2770 = vtanh.f32 %v1138_v38 }
 0xa06   : > { %2772 = vtanh.f32 %v1139_v40 }
 0xa0e   : > { %v2771_v41 = vpop.eup %2770 }
 0xa0f   : > { %1142 = vst [vmem:[%s2887_s21 + $0xb] sm:$0x1] %v2771_v41 }
 0xa10   : > { %v2773_v42 = vpop.eup %2772 }
 0xa11   : > { %1143 = vst [vmem:[%s2887_s21 + $0x1b] sm:$0x1] %v2773_v42  ;;  %v1148_v43 = vrot.slane %v2773_v42, 7 }
 0xa13   : > { %v1149_v44 = vsel %vm191_vm1, %v1148_v43, %v2771_v41 }
 0xa14   : > { %2248 = vmatmul.mubr.f32.vlgmr.msra.gmra.mrb[10].mxu1 %v1149_v44 }
 0xa15   : > { %2669 = vmatpush3.bf16.msra.mxu1 %v2842_v5  ;;  %2317 = vmatprep.mubr.msk.f32.mxu1 %vm2799_vm0, %v2800_v1 }
 0xa16   : > { %2670 = vmatprep.subr.bf16.mxu1 %v2798_v0 }
 0xa19   : > { %2672 = vmatpush3.bf16.msra.mxu1 %v2853_v7 }
 0xa1a   : > { %2673 = vmatprep.subr.bf16.mxu1 %v2798_v0 }
 0xa1d   : > { %2675 = vmatpush3.bf16.msra.mxu1 %v2863_v12 }
 0xa1e   : > { %2676 = vmatprep.subr.bf16.mxu1 %v2798_v0 }
 0xa21   : > { %2678 = vmatpush3.bf16.msra.mxu1 %v2871_v15 }
 0xa22   : > { %2679 = vmatprep.subr.bf16.mxu1 %v2798_v0 }
 0xa25   : > { %2681 = vmatpush3.bf16.msra.mxu1 %v2879_v18 }
 0xa26   : > { %2682 = vmatprep.subr.bf16.mxu1 %v2798_v0 }
 0xa29   : > { %2684 = vmatpush3.bf16.msra.mxu1 %v2896_v23 }
 0xa2a   : > { %2685 = vmatprep.subr.bf16.mxu1 %v2798_v0 }
 0xa2d   : > { %2687 = vmatpush3.bf16.msra.mxu1 %v2904_v26 }
 0xa2e   : > { %2688 = vmatprep.subr.bf16.mxu1 %v2798_v0 }
 0xa31   : > { %2690 = vmatpush3.bf16.msra.mxu1 %v2912_v29 }
 0xae7   : > { %v1217_v47 = vpop.f32.mrb[10].mxu1 }
 0xae8   : > { %v1222_v48 = vrot.slane %v1217_v47, 1  ;;  %v1225_v49 = vadd.f32 %v1217_v47, %v1144_v45  ;;  %v2249_v50 = vpop.f32.mrb[11].mxu1 }
 0xaea   : > { %v1226_v51 = vadd.f32 %v1222_v48, %v1145_v46  ;;  %2774 = vtanh.f32 %v1225_v49 }
 0xaec   : > { %2776 = vtanh.f32 %v1226_v51 }
 0xaf4   : > { %v2775_v52 = vpop.eup %2774 }
 0xaf5   : > { %1229 = vst [vmem:[%s2887_s21 + $0xc] sm:$0x1] %v2775_v52 }
 0xaf6   : > { %v2777_v53 = vpop.eup %2776 }
 0xaf7   : > { %1230 = vst [vmem:[%s2887_s21 + $0x1c] sm:$0x1] %v2777_v53  ;;  %v1235_v54 = vrot.slane %v2777_v53, 7 }
 0xaf9   : > { %v1236_v55 = vsel %vm191_vm1, %v1235_v54, %v2775_v52 }
 0xafa   : > { %2283 = vmatmul.mubr.f32.vlgmr.msra.gmra.mrb[12].mxu0 %v1236_v55 }
 0xafb   : > { %2693 = vmatpush3.bf16.msra.mxu0 %v2842_v5  ;;  %2352 = vmatprep.mubr.msk.f32.mxu0 %vm2799_vm0, %v2800_v1  ;;  %v1231_v1 = vld [vmem:[%s2850_s18 + $0xd] sm:$0x1]  ;;  %v1232_v5 = vld [vmem:[%s2850_s18 + $0x1d] sm:$0x1] }
 0xafc   : > { %2694 = vmatprep.subr.bf16.mxu0 %v2798_v0 }
 0xaff   : > { %2696 = vmatpush3.bf16.msra.mxu0 %v2853_v7 }
 0xb00   : > { %2697 = vmatprep.subr.bf16.mxu0 %v2798_v0 }
 0xb03   : > { %2699 = vmatpush3.bf16.msra.mxu0 %v2863_v12 }
 0xb04   : > { %2700 = vmatprep.subr.bf16.mxu0 %v2798_v0 }
 0xb07   : > { %2702 = vmatpush3.bf16.msra.mxu0 %v2871_v15 }
 0xb08   : > { %2703 = vmatprep.subr.bf16.mxu0 %v2798_v0 }
 0xb0b   : > { %2705 = vmatpush3.bf16.msra.mxu0 %v2879_v18 }
 0xb0c   : > { %2706 = vmatprep.subr.bf16.mxu0 %v2798_v0 }
 0xb0f   : > { %2708 = vmatpush3.bf16.msra.mxu0 %v2896_v23 }
 0xb10   : > { %2709 = vmatprep.subr.bf16.mxu0 %v2798_v0 }
 0xb13   : > { %2711 = vmatpush3.bf16.msra.mxu0 %v2904_v26 }
 0xb14   : > { %2712 = vmatprep.subr.bf16.mxu0 %v2798_v0 }
 0xb17   : > { %2714 = vmatpush3.bf16.msra.mxu0 %v2912_v29  ;;  %v1318_v29 = vld [vmem:[%s2850_s18 + $0xe] sm:$0x1] }
 0xbcd   : > { %v1304_v7 = vpop.f32.mrb[12].mxu0 }
 0xbce   : > { %v1309_v12 = vrot.slane %v1304_v7, 1  ;;  %v1312_v15 = vadd.f32 %v1304_v7, %v1231_v1  ;;  %v2284_v18 = vpop.f32.mrb[13].mxu0 }
 0xbd0   : > { %v1313_v56 = vadd.f32 %v1309_v12, %v1232_v5  ;;  %2778 = vtanh.f32 %v1312_v15 }
 0xbd2   : > { %2780 = vtanh.f32 %v1313_v56 }
 0xbda   : > { %v2779_v23 = vpop.eup %2778 }
 0xbdb   : > { %1316 = vst [vmem:[%s2887_s21 + $0xd] sm:$0x1] %v2779_v23 }
 0xbdc   : > { %v2781_v57 = vpop.eup %2780 }
 0xbdd   : > { %1317 = vst [vmem:[%s2887_s21 + $0x1d] sm:$0x1] %v2781_v57  ;;  %v1322_v0 = vrot.slane %v2781_v57, 7 }
 0xbdf   : > { %v1323_v26 = vsel %vm191_vm1, %v1322_v0, %v2779_v23 }
 0xbe0   : > { %2318 = vmatmul.mubr.f32.vlgmr.msra.gmra.mrb[12].mxu1 %v1323_v26 }
 0xcb3   : > { %v1391_v59 = vpop.f32.mrb[12].mxu1 }
 0xcb4   : > { %v1396_v60 = vrot.slane %v1391_v59, 1  ;;  %v1399_v61 = vadd.f32 %v1391_v59, %v1318_v29  ;;  %v2319_v62 = vpop.f32.mrb[13].mxu1 }
 0xcb6   : > { %v1400_v63 = vadd.f32 %v1396_v60, %v1319_v58  ;;  %2782 = vtanh.f32 %v1399_v61 }
 0xcb8   : > { %2784 = vtanh.f32 %v1400_v63 }
 0xcc0   : > { %v2783_v2 = vpop.eup %2782 }
 0xcc1   : > { %1403 = vst [vmem:[%s2887_s21 + $0xe] sm:$0x1] %v2783_v2 }
 0xcc2   : > { %v2785_v3 = vpop.eup %2784 }
 0xcc3   : > { %1404 = vst [vmem:[%s2887_s21 + $0x1e] sm:$0x1] %v2785_v3  ;;  %v1409_v4 = vrot.slane %v2785_v3, 7 }
 0xcc5   : > { %v1410_v6 = vsel %vm191_vm1, %v1409_v4, %v2783_v2 }
 0xcc6   : > { %2353 = vmatmul.mubr.f32.vlgmr.msra.gmra.mrb[14].mxu0 %v1410_v6 }
 0xd99   : > { %v1478_v10 = vpop.f32.mrb[14].mxu0 }
 0xd9a   : > { %v1483_v11 = vrot.slane %v1478_v10, 1  ;;  %v1486_v13 = vadd.f32 %v1478_v10, %v1405_v8  ;;  %v2354_v14 = vpop.f32.mrb[15].mxu0 }
 0xd9c   : > { %v1487_v16 = vadd.f32 %v1483_v11, %v1406_v9  ;;  %2786 = vtanh.f32 %v1486_v13 }
 0xd9e   : > { %2788 = vtanh.f32 %v1487_v16 }
 0xda6   : > { %v2787_v17 = vpop.eup %2786 }
 0xda7   : > { %1490 = vst [vmem:[%s2887_s21 + $0xf] sm:$0x1] %v2787_v17 }
 0xda8   : > { %v2789_v19 = vpop.eup %2788 }
 0xda9   : > { %1491 = vst [vmem:[%s2887_s21 + $0x1f] sm:$0x1] %v2789_v19 }
 0xdaa PF: > { %s12_s9 = sadd.s32 1, %s2796_s9  }
 0xdab   : > { %p9_p4 = scmp.ge.s32.totalorder %s12_s9, 4  }
 0xdad   :  { %11 = sbr.rel (!%p9_p4) target bundleno = 1 (0x1), region = 61 }

</bundles_post_ra>
